<compile_context>
chip_gen: v6e
topology: v6e:2x2x1
jax: 0.10.0
libtpu: 0.0.40
codegen_flags: <defaults>
</compile_context>

<pallas_src>
import functools

import numpy as np

import jax
import jax.numpy as jnp
from jax.experimental import pallas as pl
from jax.experimental.pallas import tpu as pltpu


# ------------------------------- fused kernel --------------------------------

def _fused_forward_kernel(x1_ref, s1_ref, s2_ref, wf1_ref, wf2_ref,
                          b1_ref, b2_ref, bf1_ref, bf2_ref, out_ref, *, bb):
    """Full SampleConvNet forward for one block of `bb` samples, fully batched.

    Stacked-row layouts (cols are W*C, channel minor; rows are (row, sample)):
      x1   : (bb*14, 272)  rows p*7*bb + i*bb + n  -> sample n, conv1 out row 2i+p,
                           cols di*34 + w          -> padded-input tap di, column w
      conv1: (bb*14, 224)  same row order, cols ow*16 + o          (14 x 14 x 16)
      pool1: (bb*7|6,208)  even/odd pool rows, cols pw*16 + c      (13 x 13 x 16)
      conv2: (bb*5, 160)   rows oh2*bb + n, cols ow2*32 + o        ( 5 x  5 x 32)
      pool2: (bb*4, 128)   rows h*bb + n,  cols w*32 + c           ( 4 x  4 x 32)
    """
    f32, bf16 = jnp.float32, jnp.bfloat16

    # ---- conv1: Conv2d(1, 16, 8, stride=2, padding=3) + ReLU (one matmul) --------
    c1 = jnp.dot(x1_ref[...], s1_ref[...], preferred_element_type=f32)   # (14bb, 224)
    c1 = jnp.maximum(c1 + b1_ref[...], 0.0)

    # ---- max_pool2d(2, 1): (14,14,16) -> (13,13,16) ------------------------------
    c1w = jnp.maximum(c1[:, 0:208], c1[:, 16:224])          # W-direction max (14bb,208)
    ew = c1w[0:7 * bb]                                       # conv rows 2i   (even)
    ow = c1w[7 * bb:14 * bb]                                 # conv rows 2i+1 (odd)
    p_e = jnp.maximum(ew, ow).astype(bf16)                   # pool rows 2j   (7bb, 208)
    p_o = jnp.maximum(ow[0:6 * bb], ew[bb:7 * bb]).astype(bf16)  # pool rows 2j+1 (6bb,208)

    # ---- conv2: Conv2d(16, 32, 4, stride=2) + ReLU (4 tap matmuls, batched) ------
    acc2 = jnp.dot(p_e[0:5 * bb], s2_ref[0], preferred_element_type=f32)       # di=0
    acc2 = acc2 + jnp.dot(p_o[0:5 * bb], s2_ref[1], preferred_element_type=f32)  # di=1
    acc2 = acc2 + jnp.dot(p_e[bb:6 * bb], s2_ref[2], preferred_element_type=f32)  # di=2
    acc2 = acc2 + jnp.dot(p_o[bb:6 * bb], s2_ref[3], preferred_element_type=f32)  # di=3
    c2 = jnp.maximum(acc2 + b2_ref[...], 0.0)                # (5bb, 160)

    # ---- max_pool2d(2, 1): (5,5,32) -> (4,4,32) ----------------------------------
    hm = jnp.maximum(c2[0:4 * bb], c2[bb:5 * bb])            # H max       (4bb, 160)
    p2 = jnp.maximum(hm[:, 0:128], hm[:, 32:160]).astype(bf16)  # W max     (4bb, 128)

    # ---- fc1: Linear(512, 32) + ReLU (4 row matmuls, NCHW flatten folded into wf1)
    acc3 = jnp.dot(p2[0:bb], wf1_ref[0], preferred_element_type=f32)
    acc3 = acc3 + jnp.dot(p2[bb:2 * bb], wf1_ref[1], preferred_element_type=f32)
    acc3 = acc3 + jnp.dot(p2[2 * bb:3 * bb], wf1_ref[2], preferred_element_type=f32)
    acc3 = acc3 + jnp.dot(p2[3 * bb:4 * bb], wf1_ref[3], preferred_element_type=f32)
    h1 = jnp.maximum(acc3 + bf1_ref[...], 0.0).astype(bf16)  # (bb, 32)

    # ---- fc2: Linear(32, 10) -> single (bb, 10) store ----------------------------
    logits = jnp.dot(h1, wf2_ref[...], preferred_element_type=f32) + bf2_ref[...]
    out_ref[...] = logits.astype(out_ref.dtype)


# --------------------------- weight pre-packing -------------------------------

def prepare_params(params):
    """One-time repack of PyTorch-layout parameters into MXU-friendly slabs.

    Conv weights become dense Toeplitz matrices folding im2col + W-stride into a
    single matmul (conv1 additionally folds the 8 H-taps into K=272); fc weights are
    pre-transposed / pre-permuted so the PyTorch NCHW flatten costs nothing at run
    time.  Matmul operands bf16, biases f32.
    """
    f32 = np.float32
    w1 = np.asarray(params["conv1_w"], f32)        # (16, 1, 8, 8)   (O, C, kh, kw)
    w2 = np.asarray(params["conv2_w"], f32)        # (32, 16, 4, 4)
    fc1_w = np.asarray(params["fc1_w"], f32)       # (32, 512)
    fc2_w = np.asarray(params["fc2_w"], f32)       # (10, 32)
    b1 = np.asarray(params["conv1_b"], f32)        # (16,)
    b2 = np.asarray(params["conv2_b"], f32)        # (32,)

    # s1[di*34 + (2*ow + dj), ow*16 + o] = w1[o, 0, di, dj]       -> (272, 224)
    s1 = np.zeros((8, 34, 224), f32)
    di, dj, ow, o = np.indices((8, 8, 14, 16))
    s1[di, 2 * ow + dj, ow * 16 + o] = w1[o, 0, di, dj]
    s1 = s1.reshape(272, 224)

    # s2[di, (2*ow + dj)*16 + c, ow*32 + o] = w2[o, c, di, dj]    -> (4, 208, 160)
    s2 = np.zeros((4, 208, 160), f32)
    di2, dj2, ow2, c2, o2 = np.indices((4, 4, 5, 16, 32))
    s2[di2, (2 * ow2 + dj2) * 16 + c2, ow2 * 32 + o2] = w2[o2, c2, di2, dj2]

    # PyTorch flatten feature index is c*16 + h*4 + w (NCHW view of (32, 4, 4)).
    # wf1[h, w*32 + c, o] = fc1_w[o, c*16 + h*4 + w]              -> (4, 128, 32)
    wf1 = fc1_w.reshape(32, 32, 4, 4).transpose(2, 3, 1, 0).reshape(4, 128, 32)

    bf16 = jnp.bfloat16
    return {
        "s1": jnp.asarray(s1, bf16),
        "s2": jnp.asarray(s2, bf16),
        "wf1": jnp.asarray(wf1, bf16),
        "wf2": jnp.asarray(fc2_w.T, bf16),                                 # (32, 10)
        "b1": jnp.asarray(np.tile(b1, 14).reshape(1, 224), jnp.float32),
        "b2": jnp.asarray(np.tile(b2, 5).reshape(1, 160), jnp.float32),
        "bf1": jnp.asarray(params["fc1_b"], jnp.float32).reshape(1, 32),
        "bf2": jnp.asarray(params["fc2_b"], jnp.float32).reshape(1, 10),
    }


# ------------------------------ fused forward ---------------------------------

def _batch_block(n):
    """Samples per grid step.

    bb=16 gives conv1 M = 224 (fills v6e/v7x's 256-row MXU, 2 passes on v5e's 128);
    bb=8 gives M = 112 (v5e sweet spot).  Prefer >= 2 grid steps whenever the batch
    allows it so dimension_semantics=("parallel",) can shard across v7x's two
    TensorCores; otherwise take the whole (small) batch in one program.
    """
    for bb in (16, 32, 8):
        if n % bb == 0 and n // bb >= 2:
            return bb
    for bb in (16, 32, 8):
        if n % bb == 0:
            return bb
    return n


def forward_prepared(x, prep):
    """x: (N, 1, 28, 28) float32; prep: output of prepare_params."""
    n = x.shape[0]
    bb = _batch_block(n)
    nb = n // bb

    # Tiny one-off XLA prep of the raw input (a few KB per sample): zero-pad to
    # 34x34 and im2col the 8 conv1 H-taps so the kernel's conv1 is ONE K=272 matmul.
    # Rows are reordered to (block, parity, out-row, sample) so every downstream
    # pool / conv2 / fc1 operand is a static contiguous slice of the stacked slab.
    xp = jnp.pad(x.reshape(n, 28, 28).astype(jnp.float32), ((0, 0), (3, 3), (3, 3)))
    row_idx = 2 * np.arange(14)[:, None] + np.arange(8)[None, :]     # (14, 8), max 33
    cols = xp[:, row_idx, :]                                         # (n, 14, 8, 34)
    cols = cols.reshape(nb, bb, 7, 2, 8 * 34)                        # oh = 2*i + p
    cols = jnp.transpose(cols, (0, 3, 2, 1, 4))                      # (nb, p, i, bb, 272)
    a1 = cols.reshape(n * 14, 272).astype(jnp.bfloat16)

    def wspec(shape):
        nd = len(shape)
        return pl.BlockSpec(shape, lambda b, _nd=nd: (0,) * _nd)     # grid-resident

    return pl.pallas_call(
        functools.partial(_fused_forward_kernel, bb=bb),
        out_shape=jax.ShapeDtypeStruct((n, 10), jnp.float32),
        grid=(nb,),
        in_specs=[
            pl.BlockSpec((bb * 14, 272), lambda b: (b, 0)),   # packed im2col input
            wspec((272, 224)),    # s1
            wspec((4, 208, 160)), # s2
            wspec((4, 128, 32)),  # wf1
            wspec((32, 10)),      # wf2
            wspec((1, 224)),      # conv1 bias (tiled over W)
            wspec((1, 160)),      # conv2 bias (tiled over W)
            wspec((1, 32)),       # fc1 bias
            wspec((1, 10)),       # fc2 bias
        ],
        out_specs=pl.BlockSpec((bb, 10), lambda b: (b, 0)),
        compiler_params=pltpu.CompilerParams(dimension_semantics=("parallel",)),
    )(a1, prep["s1"], prep["s2"], prep["wf1"], prep["wf2"],
      prep["b1"], prep["b2"], prep["bf1"], prep["bf2"])


def sample_convnet_forward(x_nchw, params):
    """Convenience wrapper keeping the original (x, raw-PyTorch-params) API."""
    return forward_prepared(x_nchw, prepare_params(params))


# ------------------------- plain-XLA f32 reference ----------------------------

def reference_forward(x, params):
    prec = jax.lax.Precision.HIGHEST
    y = jax.lax.conv_general_dilated(
        x.astype(jnp.float32), params["conv1_w"], window_strides=(2, 2),
        padding=((3, 3), (3, 3)), dimension_numbers=("NCHW", "OIHW", "NCHW"),
        precision=prec)
    y = jnp.maximum(y + params["conv1_b"].reshape(1, -1, 1, 1), 0.0)
    y = jax.lax.reduce_window(y, -jnp.inf, jax.lax.max,
                              (1, 1, 2, 2), (1, 1, 1, 1), "VALID")
    y = jax.lax.conv_general_dilated(
        y, params["conv2_w"], window_strides=(2, 2), padding=((0, 0), (0, 0)),
        dimension_numbers=("NCHW", "OIHW", "NCHW"), precision=prec)
    y = jnp.maximum(y + params["conv2_b"].reshape(1, -1, 1, 1), 0.0)
    y = jax.lax.reduce_window(y, -jnp.inf, jax.lax.max,
                              (1, 1, 2, 2), (1, 1, 1, 1), "VALID")
    y = y.reshape(y.shape[0], 32 * 4 * 4)
    y = jnp.maximum(jnp.dot(y, params["fc1_w"].T, precision=prec) + params["fc1_b"], 0.0)
    return jnp.dot(y, params["fc2_w"].T, precision=prec) + params["fc2_b"]


# --------------------------- deterministic params -----------------------------

def init_params(key):
    ks = jax.random.split(key, 8)

    def uniform(k, shape, fan_in):
        bound = 1.0 / jnp.sqrt(jnp.float32(fan_in))
        return jax.random.uniform(k, shape, jnp.float32, -bound, bound)

    return {
        "conv1_w": uniform(ks[0], (16, 1, 8, 8), 1 * 8 * 8),
        "conv1_b": uniform(ks[1], (16,), 1 * 8 * 8),
        "conv2_w": uniform(ks[2], (32, 16, 4, 4), 16 * 4 * 4),
        "conv2_b": uniform(ks[3], (32,), 16 * 4 * 4),
        "fc1_w":   uniform(ks[4], (32, 512), 512),
        "fc1_b":   uniform(ks[5], (32,), 512),
        "fc2_w":   uniform(ks[6], (10, 32), 32),
        "fc2_b":   uniform(ks[7], (10,), 32),
    }


if __name__ == "__main__":
    key = jax.random.PRNGKey(0)
    k_x, k_p = jax.random.split(key)
    # 28x28 single-channel input is required by the 32*4*4 flatten in the module.
    x = jax.random.normal(k_x, (2, 1, 28, 28), dtype=jnp.float32)
    params = init_params(k_p)

    prep = prepare_params(params)             # one-time weight repack (outside hot path)
    out = jax.block_until_ready(jax.jit(forward_prepared)(x, prep))
    assert out.shape == (2, 10), out.shape

    # Numerical check vs. a plain-XLA f32 reference of the PyTorch module
    # (kernel uses bf16 MXU operands with f32 accumulation -> small expected error).
    ref = jax.block_until_ready(jax.jit(reference_forward)(x, params))
    max_err = float(jnp.max(jnp.abs(out - ref)))
    assert max_err < 5e-2, f"max |err| vs reference = {max_err}"

    print("KERNEL_OK")
</pallas_src>

<mosaic_0001>
module attributes {stable_mosaic.version = 11 : i64} {
  func.func @_fused_forward_kernel(%arg0: i32, %arg1: memref<28x272xbf16, #tpu.memory_space<vmem>>, %arg2: memref<272x224xbf16, #tpu.memory_space<vmem>>, %arg3: memref<4x208x160xbf16, #tpu.memory_space<vmem>>, %arg4: memref<4x128x32xbf16, #tpu.memory_space<vmem>>, %arg5: memref<32x10xbf16, #tpu.memory_space<vmem>>, %arg6: memref<1x224xf32, #tpu.memory_space<vmem>>, %arg7: memref<1x160xf32, #tpu.memory_space<vmem>>, %arg8: memref<1x32xf32, #tpu.memory_space<vmem>>, %arg9: memref<1x10xf32, #tpu.memory_space<vmem>>, %arg10: memref<2x10xf32, #tpu.memory_space<vmem>>) attributes {dimension_semantics = [#tpu.dimension_semantics<parallel>], iteration_bounds = array<i64: 1>, scalar_prefetch = 0 : i64, scratch_operands = 0 : i64, tpu.core_type = #tpu.core_type<tc>, window_params = [{transform_indices = @transform_0, window_bounds = array<i64: 28, 272>}, {pipeline_mode = #tpu.pipeline_mode<synchronous>, transform_indices = @transform_1, window_bounds = array<i64: 272, 224>}, {pipeline_mode = #tpu.pipeline_mode<synchronous>, transform_indices = @transform_2, window_bounds = array<i64: 4, 208, 160>}, {pipeline_mode = #tpu.pipeline_mode<synchronous>, transform_indices = @transform_3, window_bounds = array<i64: 4, 128, 32>}, {pipeline_mode = #tpu.pipeline_mode<synchronous>, transform_indices = @transform_4, window_bounds = array<i64: 32, 10>}, {pipeline_mode = #tpu.pipeline_mode<synchronous>, transform_indices = @transform_5, window_bounds = array<i64: 1, 224>}, {pipeline_mode = #tpu.pipeline_mode<synchronous>, transform_indices = @transform_6, window_bounds = array<i64: 1, 160>}, {pipeline_mode = #tpu.pipeline_mode<synchronous>, transform_indices = @transform_7, window_bounds = array<i64: 1, 32>}, {pipeline_mode = #tpu.pipeline_mode<synchronous>, transform_indices = @transform_8, window_bounds = array<i64: 1, 10>}, {transform_indices = @transform_9, window_bounds = array<i64: 2, 10>}]} {
    %c0 = arith.constant 0 : index
    %c0_0 = arith.constant 0 : index
    %0 = vector.load %arg1[%c0, %c0_0] : memref<28x272xbf16, #tpu.memory_space<vmem>>, vector<28x272xbf16>
    %c0_1 = arith.constant 0 : index
    %c0_2 = arith.constant 0 : index
    %1 = vector.load %arg2[%c0_1, %c0_2] : memref<272x224xbf16, #tpu.memory_space<vmem>>, vector<272x224xbf16>
    %cst = arith.constant dense<0.000000e+00> : vector<28x224xf32>
    %2 = tpu.matmul %0, %1, %cst {dimension_numbers = #tpu.dot_dimension_numbers<[1], [0], [0], [1], [0, 0, 1, 1], [], []>} : vector<28x272xbf16>, vector<272x224xbf16>, vector<28x224xf32> -> vector<28x224xf32>
    %c0_3 = arith.constant 0 : index
    %c0_4 = arith.constant 0 : index
    %3 = vector.load %arg6[%c0_3, %c0_4] : memref<1x224xf32, #tpu.memory_space<vmem>>, vector<1x224xf32>
    %4 = vector.broadcast %3 : vector<1x224xf32> to vector<28x224xf32>
    %5 = arith.addf %2, %4 : vector<28x224xf32>
    %cst_5 = arith.constant 0.000000e+00 : f32
    %6 = vector.broadcast %cst_5 : f32 to vector<28x224xf32>
    %7 = arith.maximumf %5, %6 : vector<28x224xf32>
    %8 = vector.extract_strided_slice %7 {offsets = [0, 0], sizes = [28, 208], strides = [1, 1]} : vector<28x224xf32> to vector<28x208xf32>
    %9 = vector.extract_strided_slice %7 {offsets = [0, 16], sizes = [28, 208], strides = [1, 1]} : vector<28x224xf32> to vector<28x208xf32>
    %10 = arith.maximumf %8, %9 : vector<28x208xf32>
    %11 = vector.extract_strided_slice %10 {offsets = [0, 0], sizes = [14, 208], strides = [1, 1]} : vector<28x208xf32> to vector<14x208xf32>
    %12 = vector.extract_strided_slice %10 {offsets = [14, 0], sizes = [14, 208], strides = [1, 1]} : vector<28x208xf32> to vector<14x208xf32>
    %13 = arith.maximumf %11, %12 : vector<14x208xf32>
    %14 = arith.truncf %13 : vector<14x208xf32> to vector<14x208xbf16>
    %15 = vector.extract_strided_slice %12 {offsets = [0, 0], sizes = [12, 208], strides = [1, 1]} : vector<14x208xf32> to vector<12x208xf32>
    %16 = vector.extract_strided_slice %11 {offsets = [2, 0], sizes = [12, 208], strides = [1, 1]} : vector<14x208xf32> to vector<12x208xf32>
    %17 = arith.maximumf %15, %16 : vector<12x208xf32>
    %18 = arith.truncf %17 : vector<12x208xf32> to vector<12x208xbf16>
    %19 = vector.extract_strided_slice %14 {offsets = [0, 0], sizes = [10, 208], strides = [1, 1]} : vector<14x208xbf16> to vector<10x208xbf16>
    %c0_6 = arith.constant 0 : index
    %c0_7 = arith.constant 0 : index
    %c0_8 = arith.constant 0 : index
    %20 = vector.load %arg3[%c0_6, %c0_7, %c0_8] : memref<4x208x160xbf16, #tpu.memory_space<vmem>>, vector<1x208x160xbf16>
    %21 = vector.shape_cast %20 : vector<1x208x160xbf16> to vector<208x160xbf16>
    %cst_9 = arith.constant dense<0.000000e+00> : vector<10x160xf32>
    %22 = tpu.matmul %19, %21, %cst_9 {dimension_numbers = #tpu.dot_dimension_numbers<[1], [0], [0], [1], [0, 0, 1, 1], [], []>} : vector<10x208xbf16>, vector<208x160xbf16>, vector<10x160xf32> -> vector<10x160xf32>
    %23 = vector.extract_strided_slice %18 {offsets = [0, 0], sizes = [10, 208], strides = [1, 1]} : vector<12x208xbf16> to vector<10x208xbf16>
    %c1 = arith.constant 1 : index
    %c0_10 = arith.constant 0 : index
    %c0_11 = arith.constant 0 : index
    %24 = vector.load %arg3[%c1, %c0_10, %c0_11] : memref<4x208x160xbf16, #tpu.memory_space<vmem>>, vector<1x208x160xbf16>
    %25 = vector.shape_cast %24 : vector<1x208x160xbf16> to vector<208x160xbf16>
    %cst_12 = arith.constant dense<0.000000e+00> : vector<10x160xf32>
    %26 = tpu.matmul %23, %25, %cst_12 {dimension_numbers = #tpu.dot_dimension_numbers<[1], [0], [0], [1], [0, 0, 1, 1], [], []>} : vector<10x208xbf16>, vector<208x160xbf16>, vector<10x160xf32> -> vector<10x160xf32>
    %27 = arith.addf %22, %26 : vector<10x160xf32>
    %28 = vector.extract_strided_slice %14 {offsets = [2, 0], sizes = [10, 208], strides = [1, 1]} : vector<14x208xbf16> to vector<10x208xbf16>
    %c2 = arith.constant 2 : index
    %c0_13 = arith.constant 0 : index
    %c0_14 = arith.constant 0 : index
    %29 = vector.load %arg3[%c2, %c0_13, %c0_14] : memref<4x208x160xbf16, #tpu.memory_space<vmem>>, vector<1x208x160xbf16>
    %30 = vector.shape_cast %29 : vector<1x208x160xbf16> to vector<208x160xbf16>
    %cst_15 = arith.constant dense<0.000000e+00> : vector<10x160xf32>
    %31 = tpu.matmul %28, %30, %cst_15 {dimension_numbers = #tpu.dot_dimension_numbers<[1], [0], [0], [1], [0, 0, 1, 1], [], []>} : vector<10x208xbf16>, vector<208x160xbf16>, vector<10x160xf32> -> vector<10x160xf32>
    %32 = arith.addf %27, %31 : vector<10x160xf32>
    %33 = vector.extract_strided_slice %18 {offsets = [2, 0], sizes = [10, 208], strides = [1, 1]} : vector<12x208xbf16> to vector<10x208xbf16>
    %c3 = arith.constant 3 : index
    %c0_16 = arith.constant 0 : index
    %c0_17 = arith.constant 0 : index
    %34 = vector.load %arg3[%c3, %c0_16, %c0_17] : memref<4x208x160xbf16, #tpu.memory_space<vmem>>, vector<1x208x160xbf16>
    %35 = vector.shape_cast %34 : vector<1x208x160xbf16> to vector<208x160xbf16>
    %cst_18 = arith.constant dense<0.000000e+00> : vector<10x160xf32>
    %36 = tpu.matmul %33, %35, %cst_18 {dimension_numbers = #tpu.dot_dimension_numbers<[1], [0], [0], [1], [0, 0, 1, 1], [], []>} : vector<10x208xbf16>, vector<208x160xbf16>, vector<10x160xf32> -> vector<10x160xf32>
    %37 = arith.addf %32, %36 : vector<10x160xf32>
    %c0_19 = arith.constant 0 : index
    %c0_20 = arith.constant 0 : index
    %38 = vector.load %arg7[%c0_19, %c0_20] : memref<1x160xf32, #tpu.memory_space<vmem>>, vector<1x160xf32>
    %39 = vector.broadcast %38 : vector<1x160xf32> to vector<10x160xf32>
    %40 = arith.addf %37, %39 : vector<10x160xf32>
    %cst_21 = arith.constant 0.000000e+00 : f32
    %41 = vector.broadcast %cst_21 : f32 to vector<10x160xf32>
    %42 = arith.maximumf %40, %41 : vector<10x160xf32>
    %43 = vector.extract_strided_slice %42 {offsets = [0, 0], sizes = [8, 160], strides = [1, 1]} : vector<10x160xf32> to vector<8x160xf32>
    %44 = vector.extract_strided_slice %42 {offsets = [2, 0], sizes = [8, 160], strides = [1, 1]} : vector<10x160xf32> to vector<8x160xf32>
    %45 = arith.maximumf %43, %44 : vector<8x160xf32>
    %46 = vector.extract_strided_slice %45 {offsets = [0, 0], sizes = [8, 128], strides = [1, 1]} : vector<8x160xf32> to vector<8x128xf32>
    %47 = vector.extract_strided_slice %45 {offsets = [0, 32], sizes = [8, 128], strides = [1, 1]} : vector<8x160xf32> to vector<8x128xf32>
    %48 = arith.maximumf %46, %47 : vector<8x128xf32>
    %49 = arith.truncf %48 : vector<8x128xf32> to vector<8x128xbf16>
    %50 = vector.extract_strided_slice %49 {offsets = [0, 0], sizes = [2, 128], strides = [1, 1]} : vector<8x128xbf16> to vector<2x128xbf16>
    %c0_22 = arith.constant 0 : index
    %c0_23 = arith.constant 0 : index
    %c0_24 = arith.constant 0 : index
    %51 = vector.load %arg4[%c0_22, %c0_23, %c0_24] : memref<4x128x32xbf16, #tpu.memory_space<vmem>>, vector<1x128x32xbf16>
    %52 = vector.shape_cast %51 : vector<1x128x32xbf16> to vector<128x32xbf16>
    %cst_25 = arith.constant dense<0.000000e+00> : vector<2x32xf32>
    %53 = tpu.matmul %50, %52, %cst_25 {dimension_numbers = #tpu.dot_dimension_numbers<[1], [0], [0], [1], [0, 0, 1, 1], [], []>} : vector<2x128xbf16>, vector<128x32xbf16>, vector<2x32xf32> -> vector<2x32xf32>
    %54 = vector.extract_strided_slice %49 {offsets = [2, 0], sizes = [2, 128], strides = [1, 1]} : vector<8x128xbf16> to vector<2x128xbf16>
    %c1_26 = arith.constant 1 : index
    %c0_27 = arith.constant 0 : index
    %c0_28 = arith.constant 0 : index
    %55 = vector.load %arg4[%c1_26, %c0_27, %c0_28] : memref<4x128x32xbf16, #tpu.memory_space<vmem>>, vector<1x128x32xbf16>
    %56 = vector.shape_cast %55 : vector<1x128x32xbf16> to vector<128x32xbf16>
    %cst_29 = arith.constant dense<0.000000e+00> : vector<2x32xf32>
    %57 = tpu.matmul %54, %56, %cst_29 {dimension_numbers = #tpu.dot_dimension_numbers<[1], [0], [0], [1], [0, 0, 1, 1], [], []>} : vector<2x128xbf16>, vector<128x32xbf16>, vector<2x32xf32> -> vector<2x32xf32>
    %58 = arith.addf %53, %57 : vector<2x32xf32>
    %59 = vector.extract_strided_slice %49 {offsets = [4, 0], sizes = [2, 128], strides = [1, 1]} : vector<8x128xbf16> to vector<2x128xbf16>
    %c2_30 = arith.constant 2 : index
    %c0_31 = arith.constant 0 : index
    %c0_32 = arith.constant 0 : index
    %60 = vector.load %arg4[%c2_30, %c0_31, %c0_32] : memref<4x128x32xbf16, #tpu.memory_space<vmem>>, vector<1x128x32xbf16>
    %61 = vector.shape_cast %60 : vector<1x128x32xbf16> to vector<128x32xbf16>
    %cst_33 = arith.constant dense<0.000000e+00> : vector<2x32xf32>
    %62 = tpu.matmul %59, %61, %cst_33 {dimension_numbers = #tpu.dot_dimension_numbers<[1], [0], [0], [1], [0, 0, 1, 1], [], []>} : vector<2x128xbf16>, vector<128x32xbf16>, vector<2x32xf32> -> vector<2x32xf32>
    %63 = arith.addf %58, %62 : vector<2x32xf32>
    %64 = vector.extract_strided_slice %49 {offsets = [6, 0], sizes = [2, 128], strides = [1, 1]} : vector<8x128xbf16> to vector<2x128xbf16>
    %c3_34 = arith.constant 3 : index
    %c0_35 = arith.constant 0 : index
    %c0_36 = arith.constant 0 : index
    %65 = vector.load %arg4[%c3_34, %c0_35, %c0_36] : memref<4x128x32xbf16, #tpu.memory_space<vmem>>, vector<1x128x32xbf16>
    %66 = vector.shape_cast %65 : vector<1x128x32xbf16> to vector<128x32xbf16>
    %cst_37 = arith.constant dense<0.000000e+00> : vector<2x32xf32>
    %67 = tpu.matmul %64, %66, %cst_37 {dimension_numbers = #tpu.dot_dimension_numbers<[1], [0], [0], [1], [0, 0, 1, 1], [], []>} : vector<2x128xbf16>, vector<128x32xbf16>, vector<2x32xf32> -> vector<2x32xf32>
    %68 = arith.addf %63, %67 : vector<2x32xf32>
    %c0_38 = arith.constant 0 : index
    %c0_39 = arith.constant 0 : index
    %69 = vector.load %arg8[%c0_38, %c0_39] : memref<1x32xf32, #tpu.memory_space<vmem>>, vector<1x32xf32>
    %70 = vector.broadcast %69 : vector<1x32xf32> to vector<2x32xf32>
    %71 = arith.addf %68, %70 : vector<2x32xf32>
    %cst_40 = arith.constant 0.000000e+00 : f32
    %72 = vector.broadcast %cst_40 : f32 to vector<2x32xf32>
    %73 = arith.maximumf %71, %72 : vector<2x32xf32>
    %74 = arith.truncf %73 : vector<2x32xf32> to vector<2x32xbf16>
    %c0_41 = arith.constant 0 : index
    %c0_42 = arith.constant 0 : index
    %75 = vector.load %arg5[%c0_41, %c0_42] : memref<32x10xbf16, #tpu.memory_space<vmem>>, vector<32x10xbf16>
    %cst_43 = arith.constant dense<0.000000e+00> : vector<2x10xf32>
    %76 = tpu.matmul %74, %75, %cst_43 {dimension_numbers = #tpu.dot_dimension_numbers<[1], [0], [0], [1], [0, 0, 1, 1], [], []>} : vector<2x32xbf16>, vector<32x10xbf16>, vector<2x10xf32> -> vector<2x10xf32>
    %c0_44 = arith.constant 0 : index
    %c0_45 = arith.constant 0 : index
    %77 = vector.load %arg9[%c0_44, %c0_45] : memref<1x10xf32, #tpu.memory_space<vmem>>, vector<1x10xf32>
    %78 = vector.broadcast %77 : vector<1x10xf32> to vector<2x10xf32>
    %79 = arith.addf %76, %78 : vector<2x10xf32>
    %c0_46 = arith.constant 0 : index
    %c0_47 = arith.constant 0 : index
    %80 = vector.load %arg10[%c0_46, %c0_47] : memref<2x10xf32, #tpu.memory_space<vmem>>, vector<2x10xf32>
    tpu.vector_store %arg10[%c0_46, %c0_47], %79 {strides = array<i32>} : memref<2x10xf32, #tpu.memory_space<vmem>>, vector<2x10xf32>,
    return
  }
  func.func @transform_0(%arg0: i32) -> (i32, i32) {
    %c0_i32 = arith.constant 0 : i32
    %c0_i32_0 = arith.constant 0 : i32
    return %arg0, %c0_i32 : i32, i32
  }
  func.func @transform_1(%arg0: i32) -> (i32, i32) {
    %c0_i32 = arith.constant 0 : i32
    %c0_i32_0 = arith.constant 0 : i32
    %c0_i32_1 = arith.constant 0 : i32
    return %c0_i32, %c0_i32_0 : i32, i32
  }
  func.func @transform_2(%arg0: i32) -> (i32, i32, i32) {
    %c0_i32 = arith.constant 0 : i32
    %c0_i32_0 = arith.constant 0 : i32
    %c0_i32_1 = arith.constant 0 : i32
    %c0_i32_2 = arith.constant 0 : i32
    return %c0_i32, %c0_i32_0, %c0_i32_1 : i32, i32, i32
  }
  func.func @transform_3(%arg0: i32) -> (i32, i32, i32) {
    %c0_i32 = arith.constant 0 : i32
    %c0_i32_0 = arith.constant 0 : i32
    %c0_i32_1 = arith.constant 0 : i32
    %c0_i32_2 = arith.constant 0 : i32
    return %c0_i32, %c0_i32_0, %c0_i32_1 : i32, i32, i32
  }
  func.func @transform_4(%arg0: i32) -> (i32, i32) {
    %c0_i32 = arith.constant 0 : i32
    %c0_i32_0 = arith.constant 0 : i32
    %c0_i32_1 = arith.constant 0 : i32
    return %c0_i32, %c0_i32_0 : i32, i32
  }
  func.func @transform_5(%arg0: i32) -> (i32, i32) {
    %c0_i32 = arith.constant 0 : i32
    %c0_i32_0 = arith.constant 0 : i32
    %c0_i32_1 = arith.constant 0 : i32
    return %c0_i32, %c0_i32_0 : i32, i32
  }
  func.func @transform_6(%arg0: i32) -> (i32, i32) {
    %c0_i32 = arith.constant 0 : i32
    %c0_i32_0 = arith.constant 0 : i32
    %c0_i32_1 = arith.constant 0 : i32
    return %c0_i32, %c0_i32_0 : i32, i32
  }
  func.func @transform_7(%arg0: i32) -> (i32, i32) {
    %c0_i32 = arith.constant 0 : i32
    %c0_i32_0 = arith.constant 0 : i32
    %c0_i32_1 = arith.constant 0 : i32
    return %c0_i32, %c0_i32_0 : i32, i32
  }
  func.func @transform_8(%arg0: i32) -> (i32, i32) {
    %c0_i32 = arith.constant 0 : i32
    %c0_i32_0 = arith.constant 0 : i32
    %c0_i32_1 = arith.constant 0 : i32
    return %c0_i32, %c0_i32_0 : i32, i32
  }
  func.func @transform_9(%arg0: i32) -> (i32, i32) {
    %c0_i32 = arith.constant 0 : i32
    %c0_i32_0 = arith.constant 0 : i32
    return %arg0, %c0_i32 : i32, i32
  }
}

</mosaic_0001>

<bundles_post_ra>
// kernel: forward_prepared.1
= control target key start
LH: loop header
LB: loop body
LE: loop exit
PB: predicated region body
PF: predicated region fallthrough
CT: control target
= control target key end

     0   :  { %v2655_v2 = vmov 0   ;;  %vm288_vm0 = vcmask 130048   ;;  %s3390_s0 = inlined_call_operand.vmem [shape: bf16[28,272], index: 0, kind: input, shape index: {}]   ;;  %s3391_s1 = inlined_call_operand.vmem [shape: bf16[272,224], index: 1, kind: input, shape index: {}]   ;;  %s3392_s2 = inlined_call_operand.vmem [shape: bf16[4,208,160], index: 2, kind: input, shape index: {}]   ;;  %s3393_s3 = inlined_call_operand.vmem [shape: bf16[4,128,32], index: 3, kind: input, shape index: {}]   ;;  %s3394_s4 = inlined_call_operand.vmem [shape: bf16[32,10], index: 4, kind: input, shape index: {}]   ;;  %s3395_s5 = inlined_call_operand.vmem [shape: f32[1,224], index: 5, kind: input, shape index: {}]   ;;  %s3396_s6 = inlined_call_operand.vmem [shape: f32[1,160], index: 6, kind: input, shape index: {}]   ;;  %s3397_s7 = inlined_call_operand.vmem [shape: f32[1,32], index: 7, kind: input, shape index: {}]   ;;  %s3398_s8 = inlined_call_operand.vmem [shape: f32[1,10], index: 8, kind: input, shape index: {}]   ;;  %s3399_s9 = inlined_call_operand.hbm [shape: f32[2,10], index: 9, kind: output, shape index: {}]  }
   0x1   :  { %v2384_v0 = vld [vmem:[%s3391_s1 + $0x74] ss:$8 sps:$4 sm:$0xff]   ;;  %v2386_v1 = vld [vmem:[%s3391_s1 + $0x70] ss:$8 sps:$4 sm:$0xff]   ;;  %380 = vmatprep.mubr.bf16.mxu1 %v2655_v2  ;;  %v2387_v3 = vld [vmem:[%s3391_s1 + $0x64] ss:$8 sps:$4 sm:$0xff]  }
   0x2   :  { %295 = vmatprep.subr.bf16.mxu0 %v2384_v0  ;;  %v2389_v4 = vld [vmem:[%s3391_s1 + $0x60] ss:$8 sps:$4 sm:$0xff]   ;;  %v2390_v5 = vld [vmem:[%s3391_s1 + $0x54] ss:$8 sps:$4 sm:$0xff]   ;;  %v2392_v6 = vld [vmem:[%s3391_s1 + $0x50] ss:$8 sps:$4 sm:$0xff]  }
   0x3   :  { %296 = vmatpush1.bf16.msra.mxu0 %v2386_v1  ;;  %v2393_v7 = vld [vmem:[%s3391_s1 + $0x44] ss:$8 sps:$4 sm:$0xff]   ;;  %v2395_v8 = vld [vmem:[%s3391_s1 + $0x40] ss:$8 sps:$4 sm:$0xff]   ;;  %v2396_v9 = vld [vmem:[%s3391_s1 + $0x34] ss:$8 sps:$4 sm:$0xff]  }
   0x4   :  { %297 = vmatprep.subr.bf16.mxu0 %v2387_v3  ;;  %v2398_v10 = vld [vmem:[%s3391_s1 + $0x30] ss:$8 sps:$4 sm:$0xff]   ;;  %v2399_v11 = vld [vmem:[%s3391_s1 + $0x24] ss:$8 sps:$4 sm:$0xff]   ;;  %v2401_v12 = vld [vmem:[%s3391_s1 + $0x20] ss:$8 sps:$4 sm:$0xff]  }
   0x5   :  { %v2402_v13 = vld [vmem:[%s3391_s1 + $0x14] ss:$8 sps:$4 sm:$0xff]   ;;  %v2428_v14 = vld [vmem:[%s3391_s1 + $0x104] ss:$8 sps:$4 sm:$0xff]   ;;  %v2431_v15 = vld [vmem:[%s3391_s1 + $0x100] ss:$8 sps:$4 sm:$0xff]  }
   0x6   :  { %362 = vmatprep.subr.bf16.mxu1 %v2428_v14  ;;  %v2404_v16 = vld [vmem:[%s3391_s1 + $0x10] ss:$8 sps:$4 sm:$0xff]   ;;  %v2434_v17 = vld [vmem:[%s3390_s0 + $0x8] ss:$12 sps:$4 sm:$0xff]   ;;  %v2405_v18 = vld [vmem:[%s3391_s1 + $0x4] ss:$8 sps:$4 sm:$0xff]  }
   0x7   :  { %298 = vmatpush1.bf16.msra.mxu0 %v2389_v4  ;;  %363 = vmatpush1.bf16.msra.mxu1 %v2431_v15  ;;  %v2438_v19 = vld [vmem:[%s3390_s0 + $0x4] ss:$12 sps:$4 sm:$0xff]   ;;  %v2407_v20 = vld [vmem:[%s3391_s1] ss:$8 sps:$4 sm:$0xff]   ;;  %v2408_v21 = vld [vmem:[%s3391_s1 + $0xf4] ss:$8 sps:$4 sm:$0xff]  }
   0x8   :  { %299 = vmatprep.subr.bf16.mxu0 %v2390_v5  ;;  %327 = vmatprep.mubr.bf16.mxu0 %v2438_v19  ;;  %v2439_v22 = vld [vmem:[%s3390_s0 + $0x20] ss:$12 sps:$4 sm:$0x3f]   ;;  %v2410_v23 = vld [vmem:[%s3391_s1 + $0xf0] ss:$8 sps:$4 sm:$0xff]  }
   0x9   :  { %v2411_v24 = vld [vmem:[%s3391_s1 + $0xe4] ss:$8 sps:$4 sm:$0xff]   ;;  %v2413_v25 = vld [vmem:[%s3391_s1 + $0xe0] ss:$8 sps:$4 sm:$0xff]   ;;  %v2414_v26 = vld [vmem:[%s3391_s1 + $0xd4] ss:$8 sps:$4 sm:$0xff]  }
   0xa   :  { %1953 = vmatmul.mubr.msk.bf16.vlgmr.msra.gmra.mxu1 %vm288_vm0, %v2434_v17  ;;  %v2416_v27 = vld [vmem:[%s3391_s1 + $0xd0] ss:$8 sps:$4 sm:$0xff]   ;;  %v2417_v28 = vld [vmem:[%s3391_s1 + $0xc4] ss:$8 sps:$4 sm:$0xff]   ;;  %v2419_v29 = vld [vmem:[%s3391_s1 + $0xc0] ss:$8 sps:$4 sm:$0xff]  }
   0xb   :  { %300 = vmatpush1.bf16.msra.mxu0 %v2392_v6  ;;  %390 = vmatprep.mubr.bf16.mxu1 %v2655_v2  ;;  %v2420_v30 = vld [vmem:[%s3391_s1 + $0xb4] ss:$8 sps:$4 sm:$0xff]   ;;  %v2422_v31 = vld [vmem:[%s3391_s1 + $0xb0] ss:$8 sps:$4 sm:$0xff]   ;;  %v2423_v32 = vld [vmem:[%s3391_s1 + $0xa4] ss:$8 sps:$4 sm:$0xff]  }
   0xc   :  { %301 = vmatprep.subr.bf16.mxu0 %v2393_v7  ;;  %v2425_v33 = vld [vmem:[%s3391_s1 + $0xa0] ss:$8 sps:$4 sm:$0xff]   ;;  %v2426_v34 = vld [vmem:[%s3391_s1 + $0x94] ss:$8 sps:$4 sm:$0xff]   ;;  %v2430_v35 = vld [vmem:[%s3391_s1 + $0x90] ss:$8 sps:$4 sm:$0xff]  }
   0xd   :  { %v2432_v36 = vld [vmem:[%s3391_s1 + $0x84] ss:$8 sps:$4 sm:$0xff]   ;;  %v2435_v37 = vld [vmem:[%s3391_s1 + $0x80] ss:$8 sps:$4 sm:$0xff]  }
   0xe   :  { %v2436_v38 = vld [vmem:[%s3390_s0] ss:$12 sps:$4 sm:$0xff]   ;;  %v2440_v39 = vld [vmem:[%s3390_s0 + $0x1c] ss:$12 sps:$4 sm:$0x3f]  }
   0xf   :  { %302 = vmatpush1.bf16.msra.mxu0 %v2395_v8  ;;  %v2442_v40 = vld [vmem:[%s3390_s0 + $0x18] ss:$12 sps:$4 sm:$0x3f]  }
  0x10   :  { %303 = vmatprep.subr.bf16.mxu0 %v2396_v9 }
  0x12   :  { %1954 = vmatmul.mubr.msk.bf16.gmra.mxu1 %vm288_vm0, %v2439_v22 }
  0x13   :  { %304 = vmatpush1.bf16.msra.mxu0 %v2398_v10 }
  0x14   :  { %305 = vmatprep.subr.bf16.mxu0 %v2399_v11 }
  0x17   :  { %306 = vmatpush1.bf16.msra.mxu0 %v2401_v12 }
  0x18   :  { %307 = vmatprep.subr.bf16.mxu0 %v2402_v13 }
  0x1b   :  { %308 = vmatpush1.bf16.msra.mxu0 %v2404_v16 }
  0x1c   :  { %309 = vmatprep.subr.bf16.mxu0 %v2405_v18 }
  0x1f   :  { %310 = vmatpush1.bf16.msra.mxu0 %v2407_v20 }
  0x20   :  { %311 = vmatprep.subr.bf16.mxu0 %v2408_v21 }
  0x23   :  { %312 = vmatpush2.bf16.msra.mxu0 %v2410_v23 }
  0x24   :  { %313 = vmatprep.subr.bf16.mxu0 %v2411_v24 }
  0x27   :  { %314 = vmatpush2.bf16.msra.mxu0 %v2413_v25 }
  0x28   :  { %315 = vmatprep.subr.bf16.mxu0 %v2414_v26 }
  0x2b   :  { %316 = vmatpush2.bf16.msra.mxu0 %v2416_v27 }
  0x2c   :  { %317 = vmatprep.subr.bf16.mxu0 %v2417_v28 }
  0x2f   :  { %318 = vmatpush2.bf16.msra.mxu0 %v2419_v29 }
  0x30   :  { %319 = vmatprep.subr.bf16.mxu0 %v2420_v30 }
  0x33   :  { %320 = vmatpush2.bf16.msra.mxu0 %v2422_v31 }
  0x34   :  { %321 = vmatprep.subr.bf16.mxu0 %v2423_v32 }
  0x37   :  { %322 = vmatpush2.bf16.msra.mxu0 %v2425_v33 }
  0x38   :  { %323 = vmatprep.subr.bf16.mxu0 %v2426_v34 }
  0x3b   :  { %324 = vmatpush2.bf16.msra.mxu0 %v2430_v35 }
  0x3c   :  { %325 = vmatprep.subr.bf16.mxu0 %v2432_v36 }
  0x3f   :  { %326 = vmatpush2.bf16.msra.mxu0 %v2435_v37 }
  0x42   :  { %328 = vmatmul.mubr.bf16.vlgmr.msra.gmra.mxu0 %v2436_v38 }
  0x43   :  { %337 = vmatprep.mubr.bf16.mxu0 %v2440_v39 }
  0x4a   :  { %338 = vmatmul.mubr.bf16.gmra.mxu0 %v2442_v40 }
  0x4b   :  { %14 = vsyncpa [#allocation3], 0  ;;  %v2443_v41 = vld [vmem:[%s3392_s2 + $0x140] ss:$8 sps:$4 sm:$0xff]   ;;  %v2445_v42 = vld [vmem:[%s3392_s2 + $0x144] ss:$8 sps:$4 sm:$0xff]   ;;  %v78_v9 = vlaneseq }
  0x4c   :  { %v2448_v43 = vld [vmem:[%s3392_s2 + $0x134] ss:$8 sps:$4 sm:$0xff]   ;;  %698 = vmatprep.subr.bf16.mxu1 %v2445_v42  ;;  %v2452_v44 = vld [vmem:[%s3392_s2 + $0x210] ss:$8 sps:$4 sm:$0xff]   ;;  %v2460_v47 = vld [vmem:[%s3392_s2 + $0x204] ss:$8 sps:$4 sm:$0xff]  }
  0x4d   :  { %v2454_v45 = vld [vmem:[%s3392_s2 + $0x214] ss:$8 sps:$4 sm:$0xff]   ;;  %699 = vmatpush1.bf16.msra.mxu1 %v2443_v41  ;;  %v2446_v46 = vld [vmem:[%s3392_s2 + $0x130] ss:$8 sps:$4 sm:$0xff]   ;;  %v2451_v48 = vld [vmem:[%s3392_s2 + $0x124] ss:$8 sps:$4 sm:$0xff]  }
  0x4e   :  { %700 = vmatprep.subr.bf16.mxu1 %v2448_v43  ;;  %1082 = vmatprep.subr.bf16.mxu0 %v2454_v45  ;;  %v2458_v49 = vld [vmem:[%s3392_s2 + $0x200] ss:$8 sps:$4 sm:$0xff]   ;;  %v2466_v50 = vld [vmem:[%s3392_s2 + $0x1f4] ss:$8 sps:$4 sm:$0xff]   ;;  %v2464_v53 = vld [vmem:[%s3392_s2 + $0x1f0] ss:$8 sps:$4 sm:$0xff]  }
  0x4f   :  { %1083 = vmatpush1.bf16.msra.mxu0 %v2452_v44  ;;  %v2449_v51 = vld [vmem:[%s3392_s2 + $0x120] ss:$8 sps:$4 sm:$0xff]   ;;  %v2457_v52 = vld [vmem:[%s3392_s2 + $0x114] ss:$8 sps:$4 sm:$0xff]   ;;  %v2472_v54 = vld [vmem:[%s3392_s2 + $0x1e4] ss:$8 sps:$4 sm:$0xff]  }
  0x50   :  { %1084 = vmatprep.subr.bf16.mxu0 %v2460_v47  ;;  %v2455_v55 = vld [vmem:[%s3392_s2 + $0x110] ss:$8 sps:$4 sm:$0xff]   ;;  %v2463_v56 = vld [vmem:[%s3392_s2 + $0x104] ss:$8 sps:$4 sm:$0xff]   ;;  %v2470_v57 = vld [vmem:[%s3392_s2 + $0x1e0] ss:$8 sps:$4 sm:$0xff]  }
  0x51   :  { %701 = vmatpush1.bf16.msra.mxu1 %v2446_v46  ;;  %v2478_v58 = vld [vmem:[%s3392_s2 + $0x1d4] ss:$8 sps:$4 sm:$0xff]   ;;  %v2461_v59 = vld [vmem:[%s3392_s2 + $0x100] ss:$8 sps:$4 sm:$0xff]   ;;  %v2476_v61 = vld [vmem:[%s3392_s2 + $0x1d0] ss:$8 sps:$4 sm:$0xff]  }
  0x52   :  { %702 = vmatprep.subr.bf16.mxu1 %v2451_v48  ;;  %v2469_v60 = vld [vmem:[%s3392_s2 + $0xf4] ss:$8 sps:$4 sm:$0xff]   ;;  %v2484_v62 = vld [vmem:[%s3392_s2 + $0x1c4] ss:$8 sps:$4 sm:$0xff]   ;;  %v2467_v63 = vld [vmem:[%s3392_s2 + $0xf0] ss:$8 sps:$4 sm:$0xff]  }
  0x53   :  { %1085 = vmatpush1.bf16.msra.mxu0 %v2458_v49  ;;  %v2475_v0 = vld [vmem:[%s3392_s2 + $0xe4] ss:$8 sps:$4 sm:$0xff]   ;;  %v2482_v1 = vld [vmem:[%s3392_s2 + $0x1c0] ss:$8 sps:$4 sm:$0xff]   ;;  %v2490_v2 = vld [vmem:[%s3392_s2 + $0x1b4] ss:$8 sps:$4 sm:$0xff]  }
  0x54   :  { %1086 = vmatprep.subr.bf16.mxu0 %v2466_v50  ;;  %v2473_v3 = vld [vmem:[%s3392_s2 + $0xe0] ss:$8 sps:$4 sm:$0xff]   ;;  %v2481_v4 = vld [vmem:[%s3392_s2 + $0xd4] ss:$8 sps:$4 sm:$0xff]   ;;  %v2488_v5 = vld [vmem:[%s3392_s2 + $0x1b0] ss:$8 sps:$4 sm:$0xff]  }
  0x55   :  { %703 = vmatpush1.bf16.msra.mxu1 %v2449_v51  ;;  %v2479_v6 = vld [vmem:[%s3392_s2 + $0xd0] ss:$8 sps:$4 sm:$0xff]   ;;  %v2487_v7 = vld [vmem:[%s3392_s2 + $0x194] ss:$8 sps:$4 sm:$0xff]   ;;  %v2929_v11 = vshrl.u32 %v78_v9, 7  ;;  %s2656_s23 = smov 112  }
  0x56   :  { %704 = vmatprep.subr.bf16.mxu1 %v2457_v52  ;;  %v2485_v8 = vld [vmem:[%s3392_s2 + $0x190] ss:$8 sps:$4 sm:$0xff]   ;;  %v76_v14 = vld [vmem:[%s3395_s5] sm:$0x3]  ;;  %v2493_v18 = vld [vmem:[%s3392_s2 + $0x184] ss:$8 sps:$4 sm:$0xff]  }
  0x57   :  { %1087 = vmatpush1.bf16.msra.mxu0 %v2464_v53  ;;  %v80_v13 = vsub.s32 0, %v2929_v11  ;;  %v84_v15 = vsub.s32 1, %v2929_v11  ;;  %v2496_v19 = vld [vmem:[%s3392_s2 + $0x1a4] ss:$8 sps:$4 sm:$0xff]   ;;  %v2491_v21 = vld [vmem:[%s3392_s2 + $0x180] ss:$8 sps:$4 sm:$0xff]  }
  0x58   :  { %1088 = vmatprep.subr.bf16.mxu0 %v2472_v54  ;;  %v2494_v22 = vld [vmem:[%s3392_s2 + $0x1a0] ss:$8 sps:$4 sm:$0xff]   ;;  %v2499_v27 = vld [vmem:[%s3392_s2 + $0x174] ss:$8 sps:$4 sm:$0xff]   ;;  %v2502_v28 = vld [vmem:[%s3392_s2 + $0x264] ss:$8 sps:$4 sm:$0xff]  }
  0x59   :  { %705 = vmatpush1.bf16.msra.mxu1 %v2455_v55  ;;  %v81_v17 = vrot.slane %v76_v14, %v80_v13  ;;  %v2946_v20 = vrot.slane %v76_v14, %v84_v15  ;;  %v2497_v31 = vld [vmem:[%s3392_s2 + $0x170] ss:$8 sps:$4 sm:$0xff]   ;;  %v2500_v32 = vld [vmem:[%s3392_s2 + $0x260] ss:$8 sps:$4 sm:$0xff]   ;;  %v2505_v42 = vld [vmem:[%s3392_s2 + $0x164] ss:$8 sps:$4 sm:$0xff]  }
  0x5a   :  { %706 = vmatprep.subr.bf16.mxu1 %v2463_v56  ;;  %v2508_v43 = vld [vmem:[%s3392_s2 + $0x254] ss:$8 sps:$4 sm:$0xff]   ;;  %v2503_v46 = vld [vmem:[%s3392_s2 + $0x160] ss:$8 sps:$4 sm:$0xff]   ;;  %v2506_v47 = vld [vmem:[%s3392_s2 + $0x250] ss:$8 sps:$4 sm:$0xff]  }
  0x5b   :  { %1089 = vmatpush1.bf16.msra.mxu0 %v2470_v57  ;;  %v2511_v56 = vld [vmem:[%s3392_s2 + $0x154] ss:$8 sps:$4 sm:$0xff]   ;;  %v2514_v57 = vld [vmem:[%s3392_s2 + $0x244] ss:$8 sps:$4 sm:$0xff]   ;;  %v2518_v9 = vld [vmem:[%s3392_s2 + $0x230] ss:$8 sps:$4 sm:$0xff]  }
  0x5c   :  { %1090 = vmatprep.subr.bf16.mxu0 %v2478_v58  ;;  %vm433_vm1 = vcmask 916480   ;;  %vm483_vm2 = vcmask 1043456   ;;  %vm460_vm3 = vcmask 1041408   ;;  %vm694_vm4 = vcmask 654336   ;;  %v2612_v11 = vld [vmem:[%s3393_s3 + $0x88] sm:$0xff]   ;;  %s2659_s29 = smov 96  }
  0x5d   :  { %707 = vmatpush1.bf16.msra.mxu1 %v2461_v59  ;;  %vm1370_vm5 = vcmask 1045504   ;;  %vm2658_vm6 = vmmov 0   ;;  %vm1387_vm7 = vcmask 785408   ;;  %vm1853_vm8 = vcmask 261120   ;;  %s2660_s20 = smov [#allocation2]  }
  0x5e   :  { %708 = vmatprep.subr.bf16.mxu1 %v2469_v60  ;;  %v2509_v60 = vld [vmem:[%s3392_s2 + $0x150] ss:$8 sps:$4 sm:$0xff]   ;;  %s1905_s21 = sshll.u32 %s2660_s20, 4  ;;  %vm1897_vm9 = vcmask 74752   ;;  %s1906_s21 = int_to_ptr.vmem [resolvable:$true] %s1905_s21 }
  0x5f   :  { %1091 = vmatpush1.bf16.msra.mxu0 %v2476_v61  ;;  %v2512_v61 = vld [vmem:[%s3392_s2 + $0x240] ss:$8 sps:$4 sm:$0xff]   ;;  %p2638_p1 = scmp.lt.s32.totalorder %s1906_s21, %s1906_s21 }
  0x60   :  { %1092 = vmatprep.subr.bf16.mxu0 %v2484_v62 }
  0x61   :  { %709 = vmatpush1.bf16.msra.mxu1 %v2467_v63 }
  0x62   :  { %710 = vmatprep.subr.bf16.mxu1 %v2475_v0 }
  0x63   :  { %1093 = vmatpush1.bf16.msra.mxu0 %v2482_v1 }
  0x64   :  { %1094 = vmatprep.subr.bf16.mxu0 %v2490_v2 }
  0x65   :  { %711 = vmatpush1.bf16.msra.mxu1 %v2473_v3 }
  0x66   :  { %712 = vmatprep.subr.bf16.mxu1 %v2481_v4 }
  0x67   :  { %1095 = vmatpush1.bf16.msra.mxu0 %v2488_v5 }
  0x68   :  { %1096 = vmatprep.subr.bf16.mxu0 %v2496_v19 }
  0x69   :  { %713 = vmatpush1.bf16.msra.mxu1 %v2479_v6  ;;  %v2517_v6 = vld [vmem:[%s3392_s2 + $0x74] ss:$8 sps:$4 sm:$0xff]  }
  0x6a   :  { %720 = vmatprep.subr.bf16.mxu1 %v2487_v7  ;;  %v2520_v7 = vld [vmem:[%s3392_s2 + $0x234] ss:$8 sps:$4 sm:$0xff]  }
  0x6b   :  { %1097 = vmatpush1.bf16.msra.mxu0 %v2494_v22 }
  0x6c   :  { %1104 = vmatprep.subr.bf16.mxu0 %v2502_v28 }
  0x6d   :  { %721 = vmatpush2.bf16.msra.mxu1 %v2485_v8 }
  0x6e   :  { %722 = vmatprep.subr.bf16.mxu1 %v2493_v18  ;;  %v2526_v18 = vld [vmem:[%s3392_s2 + $0x224] ss:$8 sps:$4 sm:$0xff]  }
  0x6f   :  { %1105 = vmatpush2.bf16.msra.mxu0 %v2500_v32 }
  0x70   :  { %1106 = vmatprep.subr.bf16.mxu0 %v2508_v43 }
  0x71   :  { %723 = vmatpush2.bf16.msra.mxu1 %v2491_v21 }
  0x72   :  { %724 = vmatprep.subr.bf16.mxu1 %v2499_v27 }
  0x73   :  { %1107 = vmatpush2.bf16.msra.mxu0 %v2506_v47 }
  0x74   :  { %1108 = vmatprep.subr.bf16.mxu0 %v2514_v57 }
  0x75   :  { %725 = vmatpush2.bf16.msra.mxu1 %v2497_v31 }
  0x76   :  { %726 = vmatprep.subr.bf16.mxu1 %v2505_v42 }
  0x77   :  { %1109 = vmatpush2.bf16.msra.mxu0 %v2512_v61 }
  0x78   :  { %1110 = vmatprep.subr.bf16.mxu0 %v2520_v7 }
  0x79   :  { %727 = vmatpush2.bf16.msra.mxu1 %v2503_v46 }
  0x7a   :  { %728 = vmatprep.subr.bf16.mxu1 %v2511_v56 }
  0x7b   :  { %1111 = vmatpush2.bf16.msra.mxu0 %v2518_v9 }
  0x7c   :  { %1112 = vmatprep.subr.bf16.mxu0 %v2526_v18 }
  0x7d   :  { %729 = vmatpush2.bf16.msra.mxu1 %v2509_v60 }
  0x7e   :  { %874 = vmatprep.subr.bf16.mxu1 %v2517_v6 }
  0xca   :  { %v382_v10 = vpop.f32.mrf.mxu1 }
  0xcc   :  { %v384_v12 = vpop.f32.mrf.mxu1 }
  0xce   :  { %v386_v16 = vpop.f32.mrf.mxu1 }
  0xd0   :  { %v388_v24 = vpop.f32.mrf.mxu1 }
  0xd2   :  { %v392_v34 = vpop.f32.mrf.mxu1 }
  0xd4   :  { %v394_v44 = vpop.f32.mrf.mxu1 }
  0xd6   :  { %v396_v58 = vpop.f32.mrf.mxu1 }
  0xd8   :  { %v398_v8 = vpop.f32.mrf.mxu1 }
 0x102   :  { %v329_v23 = vpop.f32.mrf.mxu0 }
 0x103   :  { %v330_v25 = vadd.f32 %v329_v23, %v81_v17 }
 0x104   :  { %v331_v26 = vpop.f32.mrf.mxu0 }
 0x105   :  { %v2960_v29 = vadd.f32 %v382_v10, %v330_v25  ;;  %v332_v30 = vadd.f32 %v331_v26, %v2946_v20 }
 0x106   :  { %v333_v33 = vpop.f32.mrf.mxu0 }
 0x107   :  { %v2969_v35 = vadd.f32 %v384_v12, %v332_v30  ;;  %v334_v36 = vadd.f32 %v333_v33, %v81_v17  ;;  %v401_v38 = vmax.f32 %v2960_v29, 0.0 }
 0x108   :  { %v335_v37 = vpop.f32.mrf.mxu0 }
 0x109   :  { %v402_v39 = vmax.f32 %v2969_v35, 0.0  ;;  %v2973_v40 = vadd.f32 %v386_v16, %v334_v36  ;;  %v336_v41 = vadd.f32 %v335_v37, %v2946_v20 }
 0x10a   :  { %v339_v45 = vpop.f32.mrf.mxu0 }
 0x10b   :  { %v389_v48 = vadd.f32 %v388_v24, %v336_v41  ;;  %v340_v49 = vadd.f32 %v339_v45, %v81_v17  ;;  %v2359_v50 = vpack.i.bf16 %v402_v39, %v401_v38  ;;  %v403_v52 = vmax.f32 %v2973_v40, 0.0 }
 0x10c   :  { %v341_v51 = vpop.f32.mrf.mxu0 }
 0x10d   :  { %v404_v53 = vmax.f32 %v389_v48, 0.0  ;;  %v2993_v54 = vadd.f32 %v392_v34, %v340_v49  ;;  %v342_v55 = vadd.f32 %v341_v51, %v2946_v20  ;;  %2360 = vrot.lane.b32.xlu0 %v2359_v50, %s2656_s23 }
 0x10e   :  { %v343_v59 = vpop.f32.mrf.mxu0 }
 0x10f   :  { %v395_v62 = vadd.f32 %v394_v44, %v342_v55  ;;  %v344_v63 = vadd.f32 %v343_v59, %v81_v17  ;;  %v2364_v0 = vpack.i.bf16 %v404_v53, %v403_v52  ;;  %v405_v2 = vmax.f32 %v2993_v54, 0.0  ;;  %v2524_v17 = vld [vmem:[%s3392_s2 + $0x220] ss:$8 sps:$4 sm:$0xff]  }
 0x110   :  { %v345_v1 = vpop.f32.mrf.mxu0  ;;  %1113 = vmatpush2.bf16.msra.mxu0 %v2524_v17  ;;  %v2529_v17 = vld [vmem:[%s3392_s2 + $0x54] ss:$8 sps:$4 sm:$0xff]  }
 0x111   :  { %v406_v3 = vmax.f32 %v395_v62, 0.0  ;;  %v3010_v4 = vadd.f32 %v396_v58, %v344_v63  ;;  %v346_v5 = vadd.f32 %v345_v1, %v2946_v20  ;;  %2365 = vrot.lane.b32.xlu0 %v2364_v0, %s2656_s23  ;;  %v2515_v63 = vld [vmem:[%s3392_s2 + $0x70] ss:$8 sps:$4 sm:$0xff]  }
 0x113   :  { %v399_v10 = vadd.f32 %v398_v8, %v346_v5  ;;  %v2369_v12 = vpack.i.bf16 %v406_v3, %v405_v2  ;;  %v407_v14 = vmax.f32 %v3010_v4, 0.0  ;;  %v2523_v4 = vld [vmem:[%s3392_s2 + $0x64] ss:$8 sps:$4 sm:$0xff]  }
 0x115   :  { %v408_v16 = vmax.f32 %v399_v10, 0.0  ;;  %2370 = vrot.lane.b32.xlu1 %v2369_v12, %s2656_s23 }
 0x117   :  { %v2374_v19 = vpack.i.bf16 %v408_v16, %v407_v14 }
 0x119   :  { %2375 = vrot.lane.b32.xlu1 %v2374_v19, %s2656_s23 }
 0x17f   :  { %v2361_v20 = vpop.permute.xlu0 %2360 }
 0x180   :  { %v2363_v21 = vunpack.i.h.bf16 %v2361_v20  ;;  %v2362_v22 = vunpack.i.l.bf16 %v2361_v20 }
 0x182   :  { %v434_v23 = vsel %vm433_vm1, %v2362_v22, %v2363_v21  ;;  %v447_v25 = vmax.f32 %v402_v39, %v2363_v21 }
 0x183   :  { %v2366_v24 = vpop.permute.xlu0 %2365  ;;  %v446_v28 = vmax.f32 %v401_v38, %v434_v23  ;;  %v2527_v23 = vld [vmem:[%s3392_s2 + $0x50] ss:$8 sps:$4 sm:$0xff]  }
 0x184   :  { %v2368_v26 = vunpack.i.h.bf16 %v2366_v24  ;;  %v2367_v27 = vunpack.i.l.bf16 %v2366_v24  ;;  %v485_v34 = vrot.slane %v447_v25, 4 }
 0x185   :  { %v484_v41 = vrot.slane %v446_v28, 4 }
 0x186   :  { %v3037_v30 = vmax.f32 %v404_v53, %v2368_v26  ;;  %v435_v31 = vsel %vm433_vm1, %v2367_v27, %v2368_v26  ;;  %v2530_v26 = vld [vmem:[%s3392_s2 + $0x40] ss:$8 sps:$4 sm:$0xff]   ;;  %v2535_v27 = vld [vmem:[%s3392_s2 + $0x34] ss:$8 sps:$4 sm:$0xff]  }
 0x187   :  { %v448_v32 = vmax.f32 %v403_v52, %v435_v31  ;;  %v2371_v33 = vpop.permute.xlu1 %2370  ;;  %v2538_v31 = vld [vmem:[%s3392_s2 + $0x24] ss:$8 sps:$4 sm:$0xff]  }
 0x188   :  { %v2373_v36 = vunpack.i.h.bf16 %v2371_v33  ;;  %v2372_v37 = vunpack.i.l.bf16 %v2371_v33  ;;  %v488_v40 = vrot.slane %v3037_v30, 4  ;;  %v497_v44 = vmax.f32 %v3037_v30, %v485_v34  ;;  %v2541_v33 = vld [vmem:[%s3392_s2 + $0x14] ss:$8 sps:$4 sm:$0xff]  }
 0x189   :  { %v486_v35 = vrot.slane %v448_v32, 4  ;;  %v496_v51 = vmax.f32 %v448_v32, %v484_v41  ;;  %v464_v53 = vrot.slane %v3037_v30, 6  ;;  %v461_v57 = vrot.slane %v448_v32, 6 }
 0x18a   :  { %v451_v39 = vmax.f32 %v406_v3, %v2373_v36  ;;  %v436_v42 = vsel %vm433_vm1, %v2372_v37, %v2373_v36  ;;  %v489_v29 = vsel %vm483_vm2, %v485_v34, %v488_v40  ;;  %v2539_v34 = vld [vmem:[%s3392_s2 + $0x10] ss:$8 sps:$4 sm:$0xff]   ;;  %v2544_v36 = vld [vmem:[%s3392_s2 + $0x4] ss:$8 sps:$4 sm:$0xff]   ;;  %v2542_v37 = vld [vmem:[%s3392_s2] ss:$8 sps:$4 sm:$0xff]  }
 0x18b   :  { %v450_v38 = vmax.f32 %v405_v2, %v436_v42  ;;  %v487_v43 = vsel %vm483_vm2, %v484_v41, %v486_v35  ;;  %v2376_v45 = vpop.permute.xlu1 %2375  ;;  %v2547_v41 = vld [vmem:[%s3392_s2 + $0xc4] ss:$8 sps:$4 sm:$0xff]   ;;  %v2548_v42 = vld [vmem:[%s3392_s2 + $0xb0] ss:$8 sps:$4 sm:$0xff]  }
 0x18c   :  { %v465_v46 = vrot.slane %v451_v39, 6  ;;  %v499_v47 = vmax.f32 %v451_v39, %v489_v29  ;;  %v2378_v48 = vunpack.i.h.bf16 %v2376_v45  ;;  %v2377_v49 = vunpack.i.l.bf16 %v2376_v45  ;;  %v2550_v39 = vld [vmem:[%s3392_s2 + $0xb4] ss:$8 sps:$4 sm:$0xff]   ;;  %v2553_v29 = vld [vmem:[%s3392_s2 + $0xa4] ss:$8 sps:$4 sm:$0xff]  }
 0x18d   :  { %v462_v50 = vrot.slane %v450_v38, 6  ;;  %v498_v52 = vmax.f32 %v450_v38, %v487_v43  ;;  %v2551_v38 = vld [vmem:[%s3392_s2 + $0xa0] ss:$8 sps:$4 sm:$0xff]   ;;  %v2556_v43 = vld [vmem:[%s3392_s2 + $0x94] ss:$8 sps:$4 sm:$0xff]  }
 0x18e   :  { %v3048_v54 = vpack.c.bf16 %v499_v47, %v497_v44  ;;  %v3050_v55 = vmax.f32 %v408_v16, %v2378_v48  ;;  %v437_v56 = vsel %vm433_vm1, %v2377_v49, %v2378_v48  ;;  %v466_v60 = vsel %vm460_vm3, %v464_v53, %v465_v46  ;;  %v2554_v45 = vld [vmem:[%s3392_s2 + $0x90] ss:$8 sps:$4 sm:$0xff]   ;;  %v2557_v48 = vld [vmem:[%s3392_s2 + $0x80] ss:$8 sps:$4 sm:$0xff]  }
 0x18f   :  { %v502_v58 = vpack.c.bf16 %v498_v52, %v496_v51  ;;  %v452_v59 = vmax.f32 %v407_v14, %v437_v56  ;;  %v463_v0 = vsel %vm460_vm3, %v461_v57, %v462_v50  ;;  %v476_v7 = vmax.f32 %v447_v25, %v466_v60  ;;  %v2521_v14 = vld [vmem:[%s3392_s2 + $0x60] ss:$8 sps:$4 sm:$0xff]   ;;  %v2532_v25 = vld [vmem:[%s3392_s2 + $0x44] ss:$8 sps:$4 sm:$0xff]   ;;  %v2565_v51 = vld [vmem:[%s3392_s2 + $0x2d4] ss:$8 sps:$4 sm:$0xff]  }
 0x190   :  { %v469_v61 = vrot.slane %v3050_v55, 6  ;;  %v562_v62 = vrot.slane %v3048_v54, 3  ;;  %v475_v10 = vmax.f32 %v446_v28, %v463_v0  ;;  %v2533_v28 = vld [vmem:[%s3392_s2 + $0x30] ss:$8 sps:$4 sm:$0xff]   ;;  %v501_v44 = vmax.f32 %v3050_v55, %v488_v40  ;;  %v2560_v49 = vld [vmem:[%s3392_s2 + $0x2e0] ss:$8 sps:$4 sm:$0xff]  }
 0x191   :  { %v467_v1 = vrot.slane %v452_v59, 6  ;;  %v500_v2 = vmax.f32 %v452_v59, %v486_v35  ;;  %v561_v3 = vrot.slane %v502_v58, 3  ;;  %v1159_v18 = vrot.slane %v502_v58, 4  ;;  %v2545_v35 = vld [vmem:[%s3392_s2 + $0xc0] ss:$8 sps:$4 sm:$0xff]  }
 0x192   :  { %v470_v5 = vsel %vm460_vm3, %v465_v46, %v469_v61  ;;  %2007 = vmatprep.mubr.msk.bf16.mxu1 %vm694_vm4, %v562_v62  ;;  %v2559_v46 = vld [vmem:[%s3392_s2 + $0x84] ss:$8 sps:$4 sm:$0xff]   ;;  %v505_v47 = vpack.c.bf16 %v501_v44, %v501_v44  ;;  %v2563_v53 = vld [vmem:[%s3392_s2 + $0x2d0] ss:$8 sps:$4 sm:$0xff]   ;;  %v2571_v56 = vld [vmem:[%s3392_s2 + $0x2b4] ss:$8 sps:$4 sm:$0xff]  }
 0x193   :  { %v468_v6 = vsel %vm460_vm3, %v462_v50, %v467_v1  ;;  %731 = vmatmul.mubr.bf16.vlgmr.msra.gmra.mxu1 %v561_v3  ;;  %v478_v8 = vmax.f32 %v3037_v30, %v470_v5  ;;  %v504_v9 = vpack.c.bf16 %v500_v2, %v500_v2  ;;  %v2562_v30 = vld [vmem:[%s3392_s2 + $0x2e4] ss:$8 sps:$4 sm:$0xff]   ;;  %v1162_v50 = vrot.slane %v3048_v54, 4  ;;  %v2566_v54 = vld [vmem:[%s3392_s2 + $0x2c0] ss:$8 sps:$4 sm:$0xff]  }
 0x194   :  { %v477_v12 = vmax.f32 %v448_v32, %v468_v6  ;;  %875 = vmatpush1.bf16.msra.mxu1 %v2515_v63  ;;  %v2536_v32 = vld [vmem:[%s3392_s2 + $0x20] ss:$8 sps:$4 sm:$0xff]   ;;  %v1163_v40 = vrot.slane %v505_v47, 4  ;;  %v2568_v55 = vld [vmem:[%s3392_s2 + $0x2c4] ss:$8 sps:$4 sm:$0xff]  }
 0x195   :  { %876 = vmatprep.subr.bf16.mxu1 %v2523_v4  ;;  %v480_v16 = vpack.c.bf16 %v478_v8, %v476_v7  ;;  %v1160_v19 = vrot.slane %v504_v9, 4  ;;  %v2569_v57 = vld [vmem:[%s3392_s2 + $0x2b0] ss:$8 sps:$4 sm:$0xff]   ;;  %v2574_v58 = vld [vmem:[%s3392_s2 + $0x2a4] ss:$8 sps:$4 sm:$0xff]  }
 0x196   :  { %v479_v20 = vpack.c.bf16 %v477_v12, %v475_v10  ;;  %v1164_v52 = vsel %vm483_vm2, %v1162_v50, %v1163_v40  ;;  %v2572_v59 = vld [vmem:[%s3392_s2 + $0x2a0] ss:$8 sps:$4 sm:$0xff]   ;;  %v2577_v60 = vld [vmem:[%s3392_s2 + $0x294] ss:$8 sps:$4 sm:$0xff]   ;;  %v2575_v61 = vld [vmem:[%s3392_s2 + $0x290] ss:$8 sps:$4 sm:$0xff]  }
 0x197   :  { %2034 = vmatprep.mubr.msk.bf16.mxu1 %vm694_vm4, %v480_v16  ;;  %v947_v21 = vrot.slane %v480_v16, 1  ;;  %v3075_v22 = vsel %vm483_vm2, %v1159_v18, %v1160_v19  ;;  %v2580_v62 = vld [vmem:[%s3392_s2 + $0x284] ss:$8 sps:$4 sm:$0xff]   ;;  %v2578_v63 = vld [vmem:[%s3392_s2 + $0x280] ss:$8 sps:$4 sm:$0xff]   ;;  %v2600_v16 = vld [vmem:[%s3393_s3 + $0xb8] sm:$0xff]  }
 0x198   :  { %877 = vmatpush1.bf16.msra.mxu1 %v2521_v14  ;;  %v946_v24 = vrot.slane %v479_v20, 1  ;;  %v2583_v0 = vld [vmem:[%s3392_s2 + $0x274] ss:$8 sps:$4 sm:$0xff]   ;;  %v2581_v1 = vld [vmem:[%s3392_s2 + $0x270] ss:$8 sps:$4 sm:$0xff]  }
 0x199   :  { %2087 = vmatprep.mubr.msk.bf16.mxu0 %vm694_vm4, %v947_v21  ;;  %878 = vmatprep.subr.bf16.mxu1 %v2529_v17  ;;  %v2586_v2 = vld [vmem:[%s3392_s2 + $0x334] ss:$8 sps:$4 sm:$0xff]   ;;  %v2584_v3 = vld [vmem:[%s3392_s2 + $0x330] ss:$8 sps:$4 sm:$0xff]   ;;  %v2589_v4 = vld [vmem:[%s3392_s2 + $0x324] ss:$8 sps:$4 sm:$0xff]  }
 0x19a   :  { %1115 = vmatmul.mubr.bf16.vlgmr.msra.gmra.mxu0 %v946_v24  ;;  %v2587_v5 = vld [vmem:[%s3392_s2 + $0x320] ss:$8 sps:$4 sm:$0xff]   ;;  %v2592_v6 = vld [vmem:[%s3392_s2 + $0x314] ss:$8 sps:$4 sm:$0xff]   ;;  %v2590_v7 = vld [vmem:[%s3392_s2 + $0x310] ss:$8 sps:$4 sm:$0xff]  }
 0x19b   :  { %v2595_v8 = vld [vmem:[%s3392_s2 + $0x304] ss:$8 sps:$4 sm:$0xff]   ;;  %v2593_v9 = vld [vmem:[%s3392_s2 + $0x300] ss:$8 sps:$4 sm:$0xff]   ;;  %v2598_v10 = vld [vmem:[%s3392_s2 + $0x2f4] ss:$8 sps:$4 sm:$0xff]  }
 0x19c   :  { %879 = vmatpush1.bf16.msra.mxu1 %v2527_v23  ;;  %v2596_v12 = vld [vmem:[%s3392_s2 + $0x2f0] ss:$8 sps:$4 sm:$0xff]   ;;  %v2657_v17 = vmov 0.0   ;;  %v2604_v21 = vld [vmem:[%s3393_s3 + $0xa8] sm:$0xff]   ;;  %v2606_v23 = vld [vmem:[%s3393_s3 + $0xa0] sm:$0xff]  }
 0x19d   :  { %880 = vmatprep.subr.bf16.mxu1 %v2532_v25  ;;  %v2599_v14 = vld [vmem:[%s3393_s3 + $0x78] sm:$0xff]   ;;  %2265 = vmatprep.subr.bf16.mxu0 %v2657_v17  ;;  %v2601_v18 = vld [vmem:[%s3393_s3 + $0x70] sm:$0xff]  }
 0x19e   :  { %2266 = vmatpush3.bf16.msra.mxu0 %v2599_v14  ;;  %v2602_v19 = vld [vmem:[%s3393_s3 + $0xb0] sm:$0xff]   ;;  %v2607_v24 = vld [vmem:[%s3393_s3 + $0x58] sm:$0xff]   ;;  %2281 = vmatprep.mubr.msk.bf16.mxu0 %vm2658_vm6, %v2657_v17 }
 0x19f   :  { %2267 = vmatprep.subr.bf16.mxu0 %v2657_v17  ;;  %v2608_v25 = vld [vmem:[%s3393_s3 + $0x98] sm:$0xff]  }
 0x1a0   :  { %881 = vmatpush1.bf16.msra.mxu1 %v2530_v26  ;;  %v2609_v26 = vld [vmem:[%s3393_s3 + $0x50] sm:$0xff]  }
 0x1a1   :  { %882 = vmatprep.subr.bf16.mxu1 %v2535_v27  ;;  %v2610_v27 = vld [vmem:[%s3393_s3 + $0x90] sm:$0xff]  }
 0x1a2   :  { %2268 = vmatpush3.bf16.msra.mxu0 %v2601_v18 }
 0x1a3   :  { %2269 = vmatprep.subr.bf16.mxu0 %v2657_v17 }
 0x1a4   :  { %883 = vmatpush1.bf16.msra.mxu1 %v2533_v28 }
 0x1a5   :  { %884 = vmatprep.subr.bf16.mxu1 %v2538_v31 }
 0x1a8   :  { %885 = vmatpush1.bf16.msra.mxu1 %v2536_v32 }
 0x1a9   :  { %886 = vmatprep.subr.bf16.mxu1 %v2541_v33 }
 0x1ac   :  { %887 = vmatpush1.bf16.msra.mxu1 %v2539_v34 }
 0x1ad   :  { %888 = vmatprep.subr.bf16.mxu1 %v2544_v36 }
 0x1b0   :  { %889 = vmatpush1.bf16.msra.mxu1 %v2542_v37 }
 0x1b1   :  { %896 = vmatprep.subr.bf16.mxu1 %v2547_v41 }
 0x1b4   :  { %897 = vmatpush2.bf16.msra.mxu1 %v2545_v35 }
 0x1b5   :  { %898 = vmatprep.subr.bf16.mxu1 %v2550_v39 }
 0x1b8   :  { %899 = vmatpush2.bf16.msra.mxu1 %v2548_v42  ;;  %v1346_v42 = vld [vmem:[%s3396_s6] sm:$0x3] }
 0x1b9   :  { %900 = vmatprep.subr.bf16.mxu1 %v2553_v29 }
 0x1bc   :  { %901 = vmatpush2.bf16.msra.mxu1 %v2551_v38 }
 0x1bd   :  { %902 = vmatprep.subr.bf16.mxu1 %v2556_v43 }
 0x1c0   :  { %903 = vmatpush2.bf16.msra.mxu1 %v2554_v45  ;;  %v1351_v45 = vrot.slane %v1346_v42, %v80_v13  ;;  %v2611_v13 = vld [vmem:[%s3393_s3 + $0x48] sm:$0xff]  }
 0x1c1   :  { %904 = vmatprep.subr.bf16.mxu1 %v2559_v46 }
 0x1c4   :  { %905 = vmatpush2.bf16.msra.mxu1 %v2557_v48 }
 0x1c5   :  { %1299 = vmatprep.subr.bf16.mxu1 %v2562_v30 }
 0x1c7   :  { %907 = vmatmul.mubr.bf16.vlgmr.msra.gmra.mxu1 %v479_v20  ;;  %v2603_v20 = vld [vmem:[%s3393_s3 + $0x68] sm:$0xff]  }
 0x1c8   :  { %1300 = vmatpush1.bf16.msra.mxu1 %v2560_v49  ;;  %2140 = vmatprep.mubr.msk.bf16.mxu1 %vm694_vm4, %v1164_v52  ;;  %v1355_v49 = vrot.slane %v1346_v42, %v84_v15  ;;  %v2628_v42 = vld [vmem:[%s3393_s3 + $0xd0] sm:$0xff]  }
 0x1c9   :  { %1301 = vmatprep.subr.bf16.mxu1 %v2565_v51  ;;  %2270 = vmatpush3.bf16.msra.mxu0 %v2603_v20 }
 0x1ca   :  { %2271 = vmatprep.subr.bf16.mxu0 %v2657_v17 }
 0x1cc   :  { %1302 = vmatpush1.bf16.msra.mxu1 %v2563_v53 }
 0x1cd   :  { %1303 = vmatprep.subr.bf16.mxu1 %v2568_v55 }
 0x1d0   :  { %1304 = vmatpush1.bf16.msra.mxu1 %v2566_v54 }
 0x1d1   :  { %1305 = vmatprep.subr.bf16.mxu1 %v2571_v56 }
 0x1d4   :  { %1306 = vmatpush1.bf16.msra.mxu1 %v2569_v57 }
 0x1d5   :  { %1307 = vmatprep.subr.bf16.mxu1 %v2574_v58 }
 0x1d8   :  { %1308 = vmatpush1.bf16.msra.mxu1 %v2572_v59 }
 0x1d9   :  { %1309 = vmatprep.subr.bf16.mxu1 %v2577_v60 }
 0x1dc   :  { %1310 = vmatpush1.bf16.msra.mxu1 %v2575_v61 }
 0x1dd   :  { %1311 = vmatprep.subr.bf16.mxu1 %v2580_v62 }
 0x1e0   :  { %1312 = vmatpush1.bf16.msra.mxu1 %v2578_v63 }
 0x1e1   :  { %1313 = vmatprep.subr.bf16.mxu1 %v2583_v0 }
 0x1e4   :  { %1314 = vmatpush1.bf16.msra.mxu1 %v2581_v1  ;;  %v2613_v1 = vld [vmem:[%s3393_s3 + $0x40] sm:$0xff]  }
 0x1e5   :  { %1321 = vmatprep.subr.bf16.mxu1 %v2586_v2 }
 0x1e8   :  { %1322 = vmatpush2.bf16.msra.mxu1 %v2584_v3 }
 0x1e9   :  { %1323 = vmatprep.subr.bf16.mxu1 %v2589_v4 }
 0x1ec   :  { %1324 = vmatpush2.bf16.msra.mxu1 %v2587_v5  ;;  %v2614_v5 = vld [vmem:[%s3393_s3 + $0x80] sm:$0xff]  }
 0x1ed   :  { %1325 = vmatprep.subr.bf16.mxu1 %v2592_v6 }
 0x1f0   :  { %1326 = vmatpush2.bf16.msra.mxu1 %v2590_v7 }
 0x1f1   :  { %1327 = vmatprep.subr.bf16.mxu1 %v2595_v8 }
 0x1f4   :  { %1328 = vmatpush2.bf16.msra.mxu1 %v2593_v9 }
 0x1f5   :  { %1329 = vmatprep.subr.bf16.mxu1 %v2598_v10 }
 0x1f8   :  { %1330 = vmatpush2.bf16.msra.mxu1 %v2596_v12 }
 0x1f9   :  { %2305 = vmatprep.subr.bf16.mxu1 %v2657_v17 }
 0x1fb   :  { %1332 = vmatmul.mubr.bf16.vlgmr.msra.gmra.mxu1 %v3075_v22  ;;  %v2605_v22 = vld [vmem:[%s3393_s3 + $0x60] sm:$0xff]  }
 0x1fc   :  { %2306 = vmatpush3.bf16.msra.mxu1 %v2600_v16  ;;  %2272 = vmatpush3.bf16.msra.mxu0 %v2605_v22 }
 0x1fd   :  { %2307 = vmatprep.subr.bf16.mxu1 %v2657_v17  ;;  %2273 = vmatprep.subr.bf16.mxu0 %v2657_v17 }
 0x1fe   :  { %2321 = vmatprep.mubr.msk.bf16.mxu1 %vm2658_vm6, %v2657_v17 }
 0x200   :  { %2308 = vmatpush3.bf16.msra.mxu1 %v2602_v19  ;;  %2274 = vmatpush3.bf16.msra.mxu0 %v2607_v24 }
 0x201   :  { %2309 = vmatprep.subr.bf16.mxu1 %v2657_v17  ;;  %2275 = vmatprep.subr.bf16.mxu0 %v2657_v17 }
 0x204   :  { %2310 = vmatpush3.bf16.msra.mxu1 %v2604_v21  ;;  %2276 = vmatpush3.bf16.msra.mxu0 %v2609_v26  ;;  %v2616_v26 = vld [vmem:[%s3393_s3 + $0x30] sm:$0xff]  }
 0x205   :  { %2311 = vmatprep.subr.bf16.mxu1 %v2657_v17  ;;  %2277 = vmatprep.subr.bf16.mxu0 %v2657_v17 }
 0x208   :  { %2312 = vmatpush3.bf16.msra.mxu1 %v2606_v23  ;;  %2278 = vmatpush3.bf16.msra.mxu0 %v2611_v13  ;;  %v2615_v23 = vld [vmem:[%s3393_s3 + $0x38] sm:$0xff]  }
 0x209   :  { %2313 = vmatprep.subr.bf16.mxu1 %v2657_v17  ;;  %2279 = vmatprep.subr.bf16.mxu0 %v2657_v17 }
 0x20c   :  { %2314 = vmatpush3.bf16.msra.mxu1 %v2608_v25  ;;  %2280 = vmatpush3.bf16.msra.mxu0 %v2613_v1 }
 0x20d   :  { %2315 = vmatprep.subr.bf16.mxu1 %v2657_v17  ;;  %2285 = vmatprep.subr.bf16.mxu0 %v2657_v17 }
 0x210   :  { %2316 = vmatpush3.bf16.msra.mxu1 %v2610_v27  ;;  %v2617_v27 = vld [vmem:[%s3393_s3 + $0x28] sm:$0xff]  }
 0x211   :  { %2317 = vmatprep.subr.bf16.mxu1 %v2657_v17 }
 0x214   :  { %2318 = vmatpush3.bf16.msra.mxu1 %v2612_v11 }
 0x215   :  { %2319 = vmatprep.subr.bf16.mxu1 %v2657_v17 }
 0x218   :  { %2320 = vmatpush3.bf16.msra.mxu1 %v2614_v5 }
 0x219   :  { %2345 = vmatprep.subr.bf16.mxu1 %v2657_v17 }
 0x253   :  { %v732_v28 = vpop.f32.mrf.mxu1 }
 0x255   :  { %v734_v31 = vpop.f32.mrf.mxu1 }
 0x257   :  { %v736_v32 = vpop.f32.mrf.mxu1 }
 0x259   :  { %v738_v33 = vpop.f32.mrf.mxu1 }
 0x25a   :  { %v1116_v37 = vpop.f32.mrf.mxu0 }
 0x25c   :  { %v1118_v39 = vpop.f32.mrf.mxu0 }
 0x25e   :  { %v1120_v46 = vpop.f32.mrf.mxu0 }
 0x260   :  { %v1122_v55 = vpop.f32.mrf.mxu0 }
 0x287   :  { %v908_v34 = vpop.f32.mrf.mxu1 }
 0x288   :  { %v909_v35 = vadd.f32 %v908_v34, %v732_v28  ;;  %v2618_v28 = vld [vmem:[%s3393_s3 + $0x20] sm:$0xff]  }
 0x289   :  { %v910_v36 = vpop.f32.mrf.mxu1  ;;  %v2622_v34 = vld [vmem:[%s3393_s3] sm:$0xff]  }
 0x28a   :  { %v911_v29 = vadd.f32 %v910_v36, %v734_v31  ;;  %v1125_v44 = vadd.f32 %v1116_v37, %v909_v35  ;;  %v2619_v31 = vld [vmem:[%s3393_s3 + $0x18] sm:$0xff]   ;;  %v2624_v37 = vld [vmem:[%s3393_s3 + $0xf0] sm:$0xff]   ;;  %v2626_v35 = vld [vmem:[%s3393_s3 + $0xe0] sm:$0xff]  }
 0x28b   :  { %v912_v41 = vpop.f32.mrf.mxu1  ;;  %v2623_v36 = vld [vmem:[%s3393_s3 + $0xf8] sm:$0xff]  }
 0x28c   :  { %v913_v43 = vadd.f32 %v912_v41, %v736_v32  ;;  %v1126_v40 = vadd.f32 %v1118_v39, %v911_v29  ;;  %v2620_v32 = vld [vmem:[%s3393_s3 + $0x10] sm:$0xff]   ;;  %v2625_v41 = vld [vmem:[%s3393_s3 + $0xe8] sm:$0xff]   ;;  %v2627_v39 = vld [vmem:[%s3393_s3 + $0xd8] sm:$0xff]  }
 0x28d   :  { %v914_v38 = vpop.f32.mrf.mxu1  ;;  %v2629_v29 = vld [vmem:[%s3393_s3 + $0xc8] sm:$0xff]  }
 0x28e   :  { %v915_v48 = vadd.f32 %v914_v38, %v738_v33  ;;  %v1127_v53 = vadd.f32 %v1120_v46, %v913_v43  ;;  %v2621_v33 = vld [vmem:[%s3393_s3 + $0x8] sm:$0xff]   ;;  %v2630_v38 = vld [vmem:[%s3393_s3 + $0xc0] sm:$0xff]  }
 0x290   :  { %v1128_v58 = vadd.f32 %v1122_v55, %v915_v48 }
 0x2bb   :  { %v1333_v47 = vpop.f32.mrf.mxu1 }
 0x2bc   :  { %v1342_v30 = vadd.f32 %v1333_v47, %v1125_v44  ;;  %v2631_v44 = vld [vmem:[%s3394_s4 + $0x8] sm:$0xff]  }
 0x2bd   :  { %v1335_v50 = vpop.f32.mrf.mxu1 }
 0x2be   :  { %v1358_v51 = vadd.f32 %v1351_v45, %v1342_v30  ;;  %v1343_v52 = vadd.f32 %v1335_v50, %v1126_v40 }
 0x2bf   :  { %v1337_v54 = vpop.f32.mrf.mxu1 }
 0x2c0   :  { %v1359_v56 = vadd.f32 %v1355_v49, %v1343_v52  ;;  %v1344_v57 = vadd.f32 %v1337_v54, %v1127_v53  ;;  %v1362_v60 = vmax.f32 %v1358_v51, 0.0 }
 0x2c1   :  { %v1339_v59 = vpop.f32.mrf.mxu1 }
 0x2c2   :  { %v1360_v61 = vadd.f32 %v1351_v45, %v1344_v57  ;;  %v1345_v62 = vadd.f32 %v1339_v59, %v1128_v58  ;;  %v1363_v15 = vmax.f32 %v1359_v56, 0.0  ;;  %v1371_v2 = vrot.slane %v1362_v60, 2  ;;  %v2632_v45 = vld [vmem:[%s3394_s4] sm:$0xff]  }
 0x2c3   :  { %v2221_v58 = vld [vmem:[%s3397_s7] ss:$0 sm:$0xff]  ;;  %s2633_s7 = scalar_lea.vmem %s1906_s21, 32 }
 0x2c4   :  { %v1364_v63 = vmax.f32 %v1360_v61, 0.0  ;;  %v1361_v0 = vadd.f32 %v1355_v49, %v1345_v62  ;;  %v1374_v6 = vrot.slane %v1363_v15, 2  ;;  %p2634_p0 = scmp.ne.s32.totalorder %s1906_s21, %s2633_s7  ;;  %p2639_p2 = scmp.lt.s32.totalorder %s2633_s7, %s2633_s7 }
 0x2c6   :  { %v1372_v3 = vrot.slane %v1364_v63, 2  ;;  %v1365_v4 = vmax.f32 %v1361_v0, 0.0  ;;  %v2222_v63 = vld [vmem:[%s3398_s8] ss:$0 sm:$0xff]  ;;  %p2640_p3 = por %p2639_p2, %p2638_p1 }
 0x2c8   :  { %v1375_v7 = vrot.slane %v1365_v4, 2  ;;  %v1373_v8 = vsel %vm1370_vm5, %v1371_v2, %v1372_v3  ;;  %p2641_p4 = pnand %p2640_p3, %p2634_p0 }
 0x2c9   :  { %v1379_v10 = vmax.f32 %v1362_v60, %v1373_v8 }
 0x2ca   :  { %v1376_v9 = vsel %vm1370_vm5, %v1374_v6, %v1375_v7 }
 0x2cb   :  { %v1380_v12 = vmax.f32 %v1363_v15, %v1376_v9 }
 0x2cd   :  { %v2379_v14 = vpack.i.bf16 %v1380_v12, %v1379_v10 }
 0x2cf   :  { %2380 = vrot.lane.b32.xlu0 %v2379_v14, %s2659_s29 }
 0x341   :  { %v2381_v16 = vpop.permute.xlu0 %2380 }
 0x342   :  { %v2383_v18 = vunpack.i.h.bf16 %v2381_v16  ;;  %v2382_v19 = vunpack.i.l.bf16 %v2381_v16 }
 0x344   :  { %v1388_v20 = vsel %vm1387_vm7, %v2382_v19, %v2383_v18 }
 0x345   :  { %v1390_v21 = vmax.f32 %v1379_v10, %v1388_v20 }
 0x347   :  { %v1391_v22 = vpack.c.bf16 %v1390_v21, %v1390_v21 }
 0x349   :  { %v1426_v24 = vrot.slane %v1391_v22, 1  ;;  %v1621_v25 = vrot.slane %v1391_v22, 2  ;;  %v1729_v43 = vrot.slane %v1391_v22, 3 }
 0x34b   :  { %2282 = vmatmul.mubr.bf16.vlgmr.msra.gmra.mxu0 %v1426_v24  ;;  %2322 = vmatmul.mubr.bf16.vlgmr.msra.gmra.mxu1 %v1621_v25 }
 0x34c   :  { %2286 = vmatpush3.bf16.msra.mxu0 %v2615_v23  ;;  %2301 = vmatprep.mubr.msk.bf16.mxu0 %vm2658_vm6, %v2657_v17 }
 0x34d   :  { %2287 = vmatprep.subr.bf16.mxu0 %v2657_v17  ;;  %2349 = vmatprep.mubr.msk.bf16.mxu1 %vm2658_vm6, %v2657_v17 }
 0x34e   :  { %2346 = vmatpush3.bf16.msra.mxu1 %v2631_v44 }
 0x34f   :  { %2347 = vmatprep.subr.bf16.mxu1 %v2657_v17 }
 0x350   :  { %2288 = vmatpush3.bf16.msra.mxu0 %v2616_v26 }
 0x351   :  { %2289 = vmatprep.subr.bf16.mxu0 %v2657_v17 }
 0x352   :  { %2348 = vmatpush3.bf16.msra.mxu1 %v2632_v45 }
 0x354   :  { %2290 = vmatpush3.bf16.msra.mxu0 %v2617_v27 }
 0x355   :  { %2291 = vmatprep.subr.bf16.mxu0 %v2657_v17 }
 0x358   :  { %2292 = vmatpush3.bf16.msra.mxu0 %v2618_v28 }
 0x359   :  { %2293 = vmatprep.subr.bf16.mxu0 %v2657_v17 }
 0x35c   :  { %2294 = vmatpush3.bf16.msra.mxu0 %v2619_v31 }
 0x35d   :  { %2295 = vmatprep.subr.bf16.mxu0 %v2657_v17 }
 0x360   :  { %2296 = vmatpush3.bf16.msra.mxu0 %v2620_v32 }
 0x361   :  { %2297 = vmatprep.subr.bf16.mxu0 %v2657_v17 }
 0x364   :  { %2298 = vmatpush3.bf16.msra.mxu0 %v2621_v33 }
 0x365   :  { %2299 = vmatprep.subr.bf16.mxu0 %v2657_v17 }
 0x368   :  { %2300 = vmatpush3.bf16.msra.mxu0 %v2622_v34 }
 0x369   :  { %2325 = vmatprep.subr.bf16.mxu0 %v2657_v17 }
 0x36b   :  { %2302 = vmatmul.mubr.bf16.vlgmr.msra.gmra.mxu0 %v1391_v22 }
 0x36c   :  { %2326 = vmatpush3.bf16.msra.mxu0 %v2623_v36  ;;  %2341 = vmatprep.mubr.msk.bf16.mxu0 %vm2658_vm6, %v2657_v17 }
 0x36d   :  { %2327 = vmatprep.subr.bf16.mxu0 %v2657_v17 }
 0x370   :  { %2328 = vmatpush3.bf16.msra.mxu0 %v2624_v37 }
 0x371   :  { %2329 = vmatprep.subr.bf16.mxu0 %v2657_v17 }
 0x374   :  { %2330 = vmatpush3.bf16.msra.mxu0 %v2625_v41 }
 0x375   :  { %2331 = vmatprep.subr.bf16.mxu0 %v2657_v17 }
 0x378   :  { %2332 = vmatpush3.bf16.msra.mxu0 %v2626_v35 }
 0x379   :  { %2333 = vmatprep.subr.bf16.mxu0 %v2657_v17 }
 0x37c   :  { %2334 = vmatpush3.bf16.msra.mxu0 %v2627_v39 }
 0x37d   :  { %2335 = vmatprep.subr.bf16.mxu0 %v2657_v17 }
 0x380   :  { %2336 = vmatpush3.bf16.msra.mxu0 %v2628_v42 }
 0x381   :  { %2337 = vmatprep.subr.bf16.mxu0 %v2657_v17 }
 0x384   :  { %2338 = vmatpush3.bf16.msra.mxu0 %v2629_v29 }
 0x385   :  { %2339 = vmatprep.subr.bf16.mxu0 %v2657_v17 }
 0x388   :  { %2340 = vmatpush3.bf16.msra.mxu0 %v2630_v38 }
 0x38b   :  { %2342 = vmatmul.mubr.bf16.vlgmr.msra.gmra.mxu0 %v1729_v43 }
 0x40b   :  { %v1510_v46 = vpop.f32.mrf.mxu0  ;;  %v1705_v47 = vpop.f32.mrf.mxu1 }
 0x40d   :  { %v2283_v48 = vpop.f32.mrf.mxu0  ;;  %v2323_v30 = vpop.f32.mrf.mxu1 }
 0x40f   :  { %v1513_v40 = vpop.f32.mrf.mxu0  ;;  %v1708_v49 = vpop.f32.mrf.mxu1 }
 0x411   :  { %v2284_v50 = vpop.f32.mrf.mxu0  ;;  %v2324_v51 = vpop.f32.mrf.mxu1 }
 0x42b   :  { %v1598_v52 = vpop.f32.mrf.mxu0 }
 0x42c   :  { %v1599_v56 = vadd.f32 %v1598_v52, %v1510_v46 }
 0x42d   :  { %v2303_v53 = vpop.f32.mrf.mxu0 }
 0x42e   :  { %v1711_v57 = vadd.f32 %v1705_v47, %v1599_v56 }
 0x42f   :  { %v1601_v55 = vpop.f32.mrf.mxu0 }
 0x431   :  { %v2304_v54 = vpop.f32.mrf.mxu0 }
 0x44b   :  { %v1813_v17 = vpop.f32.mrf.mxu0 }
 0x44c   :  { %v1819_v59 = vadd.f32 %v1813_v17, %v1711_v57 }
 0x44d   :  { %v2343_v13 = vpop.f32.mrf.mxu0 }
 0x44e   :  { %v1827_v60 = vadd.f32 %v2221_v58, %v1819_v59 }
 0x44f   :  { %v1816_v61 = vpop.f32.mrf.mxu0 }
 0x450   :  { %v1828_v62 = vmax.f32 %v1827_v60, 0.0 }
 0x451   :  { %v2344_v11 = vpop.f32.mrf.mxu0 }
 0x452   :  { %v1829_v15 = vpack.c.bf16 %v1828_v62, %v1828_v62 }
 0x454   :  { %2350 = vmatmul.mubr.msk.bf16.vlgmr.msra.gmra.mxu1 %vm1853_vm8, %v1829_v15 }
 0x514   :  { %v1891_v0 = vpop.f32.mrf.mxu1 }
 0x515   :  { %v1892_v1 = vadd.f32 %v2222_v63, %v1891_v0 }
 0x516   :  { %v2351_v2 = vpop.f32.mrf.mxu1 }
 0x517   :  { %1898 = vst.msk [vmem:[#allocation2] sm:$0x3] %vm1897_vm9, %v1892_v1 }
 0x518   :  { %v1894_v3 = vpop.f32.mrf.mxu1 }
 0x519   :  { %2644 = shalt.err (!%p2641_p4)
}
 0x51a   :  { %1908 = dma.vmem_to_hbm [thread:$0]  %s1906_s21, 32, %s3399_s9, [#allocation3]   ;;  %v2352_v4 = vpop.f32.mrf.mxu1 }
 0x51b   :  { %2653 = dma.done.wait [#allocation3], 32  }
 0x51c   :  { %2654 = vsyncadd [#allocation3], 4294967264 }
 0x51d   :  { %1912 = vsyncpa [#allocation3], 1 }

</bundles_post_ra>
